<compile_context>
chip_gen: v6e
topology: v6e:2x2x1
jax: 0.10.0
libtpu: 0.0.40
codegen_flags: <defaults>
</compile_context>

<pallas_src>
from functools import partial

import jax
import jax.numpy as jnp
from jax.experimental import pallas as pl
from jax.experimental.pallas import tpu as pltpu

_LANES = 128
_BN_EPS = 1e-3
_NEG = -1e9          # bias / BN-beta value for padded vocab columns -> exp() == 0


def _round_up(n, m):
    return (n + m - 1) // m * m


def _row_mask_and_inv_n(pb, n_valid):
    """Row mask over the valid (un-padded) batch rows, and 1/n for BN stats."""
    inv_n = jnp.float32(1.0 / n_valid)
    if n_valid >= pb:
        return None, inv_n
    rows = jax.lax.broadcasted_iota(jnp.int32, (pb, 1), 0)
    return (rows < n_valid).astype(jnp.float32), inv_n


def _masked_batchnorm(v, mask, inv_n, beta):
    """BatchNorm1d, training mode, eps=1e-3, gamma frozen at 1 (folded away),
    biased batch statistics over the valid rows only (matches torch)."""
    vm = v if mask is None else v * mask
    mean = jnp.sum(vm, axis=0, keepdims=True) * inv_n
    centered = v - mean
    sq = centered * centered
    if mask is not None:
        sq = sq * mask
    var = jnp.sum(sq, axis=0, keepdims=True) * inv_n
    return centered * jax.lax.rsqrt(var + _BN_EPS) + beta


# ----------------------------------------------------------------------------
# Pass A: encoder reduction over vocab tiles + decoder online-softmax stats
# ----------------------------------------------------------------------------
def _encoder_stats_kernel(x_ref, w_emb_ref, w_eta_ref, b_eta_ref, dec_beta_ref,
                          z_ref, b_emb_ref, w_alpha_ref, b_alpha_ref, enc_beta_ref,
                          alpha_ref, m_eta_ref, l_eta_ref, m_bn_ref, l_bn_ref,
                          emb_acc, *, n_valid, anneal):
    j = pl.program_id(0)
    n_tiles = pl.num_programs(0)
    pb = emb_acc.shape[0]
    mask, inv_n = _row_mask_and_inv_n(pb, n_valid)

    @pl.when(j == 0)
    def _init():
        emb_acc[...] = jnp.zeros_like(emb_acc)
        m_eta_ref[...] = jnp.full_like(m_eta_ref, -jnp.inf)
        l_eta_ref[...] = jnp.zeros_like(l_eta_ref)
        m_bn_ref[...] = jnp.full_like(m_bn_ref, -jnp.inf)
        l_bn_ref[...] = jnp.zeros_like(l_bn_ref)

    # -------- encoder partial sum: acc += x[:, tile] @ w_emb[tile, :] --------
    x_tile = x_ref[...].astype(jnp.bfloat16)        # int8 HBM operand -> bf16 MXU
    emb_acc[...] += jnp.dot(x_tile, w_emb_ref[...],
                            preferred_element_type=jnp.float32)

    # -------- decoder eta tile + online softmax statistics -------------------
    eta = jnp.dot(z_ref[...], w_eta_ref[...],
                  preferred_element_type=jnp.float32) + b_eta_ref[...]

    def _online_update(v, m_ref, l_ref):
        m_old = m_ref[...]
        m_new = jnp.maximum(m_old, jnp.max(v, axis=-1, keepdims=True))
        l_ref[...] = (l_ref[...] * jnp.exp(m_old - m_new)
                      + jnp.sum(jnp.exp(v - m_new), axis=-1, keepdims=True))
        m_ref[...] = m_new

    if anneal != 0.0:                                # un-normalized branch used
        _online_update(eta, m_eta_ref, l_eta_ref)
    if anneal != 1.0:                                # BatchNorm branch used
        eta_bn = _masked_batchnorm(eta, mask, inv_n, dec_beta_ref[...])
        _online_update(eta_bn, m_bn_ref, l_bn_ref)

    # -------- finalize encoder on the last vocab tile ------------------------
    @pl.when(j == n_tiles - 1)
    def _finalize():
        embedded = jnp.maximum(emb_acc[...] + b_emb_ref[...], 0.0)   # ReLU
        # TODO(synk): Dropout(p>0) not implemented (identity == the p=0 path).
        alpha = jnp.dot(embedded, w_alpha_ref[...].astype(jnp.float32),
                        preferred_element_type=jnp.float32) + b_alpha_ref[...]
        alpha_bn = _masked_batchnorm(alpha, mask, inv_n, enc_beta_ref[...])
        alpha_ref[...] = jnp.maximum(jax.nn.softplus(alpha_bn), 1e-5)
        if anneal == 0.0:            # unused branch: emit benign stats
            m_eta_ref[...] = jnp.zeros_like(m_eta_ref)
            l_eta_ref[...] = jnp.ones_like(l_eta_ref)
        if anneal == 1.0:
            m_bn_ref[...] = jnp.zeros_like(m_bn_ref)
            l_bn_ref[...] = jnp.ones_like(l_bn_ref)


# ----------------------------------------------------------------------------
# Pass B: decoder write (vocab tiles are independent -> 'parallel')
# ----------------------------------------------------------------------------
def _decoder_write_kernel(z_ref, w_eta_ref, b_eta_ref, dec_beta_ref,
                          m_eta_ref, l_eta_ref, m_bn_ref, l_bn_ref,
                          xrecon_ref, *, n_valid, anneal):
    pb = z_ref.shape[0]
    mask, inv_n = _row_mask_and_inv_n(pb, n_valid)

    eta = jnp.dot(z_ref[...], w_eta_ref[...],
                  preferred_element_type=jnp.float32) + b_eta_ref[...]

    # Blend terms are formed sequentially (one tile-sized live f32 buffer at a
    # time); the f32 accumulation happens in registers before the bf16 store.
    # TODO(synk): pl.reciprocal(approx=True) leaves row sums ~1e-2 from 1; use
    #             an exact reciprocal if x_recon feeds log-likelihood scoring.
    out = None
    if anneal != 0.0:
        p = jnp.exp(eta - m_eta_ref[...]) * pl.reciprocal(l_eta_ref[...], approx=True)
        out = p if anneal == 1.0 else anneal * p
    if anneal != 1.0:
        eta_bn = _masked_batchnorm(eta, mask, inv_n, dec_beta_ref[...])
        p = jnp.exp(eta_bn - m_bn_ref[...]) * pl.reciprocal(l_bn_ref[...], approx=True)
        term = p if anneal == 0.0 else (1.0 - anneal) * p
        out = term if out is None else out + term
    xrecon_ref[...] = out.astype(xrecon_ref.dtype)


# ----------------------------------------------------------------------------
# Wrapper: two pallas_calls over a vocab-tile grid
# ----------------------------------------------------------------------------
def vae_pallas_forward(params, x, z_prior, num_topics, bn_annealing_factor,
                       *, vocab_tile=512, x_int8=True):
    """Encoder.forward + Decoder.forward.  Returns (alpha_pos f32 [B, topics],
    x_recon bf16 [B, vocab]).  bn_annealing_factor must be a static float."""
    batch, vocab = x.shape
    emb = params["w_emb"].shape[1]
    k_pad = params["w_alpha"].shape[1]               # num_topics rounded up to 128
    anneal = float(bn_annealing_factor)              # compile-time specialization

    x_dtype = jnp.int8 if x_int8 else jnp.bfloat16
    row_align = 32 if x_int8 else 16                 # dtype-aware sublane packing
    pb = _round_up(batch, row_align)
    tv = min(_round_up(vocab, _LANES), _round_up(vocab_tile, _LANES))
    vp = _round_up(vocab, tv)
    n_tiles = vp // tv

    # Padded vocab columns get bias / BN-beta = _NEG so exp() underflows to 0
    # and they never contribute to the softmax normalizers.
    x_p = jnp.pad(x, ((0, pb - batch), (0, vp - vocab))).astype(x_dtype)
    z_p = jnp.pad(z_prior, ((0, pb - batch), (0, k_pad - num_topics))).astype(jnp.bfloat16)
    w_emb_p = jnp.pad(params["w_emb"], ((0, vp - vocab), (0, 0)))
    w_eta_p = jnp.pad(params["w_eta"], ((0, 0), (0, vp - vocab)))
    b_eta_p = jnp.pad(params["b_eta"], ((0, 0), (0, vp - vocab)), constant_values=_NEG)
    dec_beta_p = jnp.pad(params["dec_bn_beta"], ((0, 0), (0, vp - vocab)),
                         constant_values=_NEG)
    # TODO(synk): pre-pad parameters once outside the step function to avoid
    #             the per-call HBM copy of w_emb / w_eta at large vocab sizes.

    const_map = lambda j: (0, 0)
    cols_map = lambda j: (0, j)

    def nbytes(shape, dtype):
        n = 1
        for s in shape:
            n *= int(s)
        return n * jnp.dtype(dtype).itemsize

    n_branches = int(anneal != 0.0) + int(anneal != 1.0)

    # ----- cost estimates (advisory, helps XLA schedule around the calls) ----
    bytes_a = (nbytes((pb, vp), x_dtype) + nbytes((vp, emb), jnp.bfloat16)
               + nbytes((k_pad, vp), jnp.bfloat16) + 2 * nbytes((1, vp), jnp.float32)
               + nbytes((pb, k_pad), jnp.bfloat16) + nbytes((emb, k_pad), jnp.bfloat16)
               + nbytes((pb, k_pad), jnp.float32) + 4 * nbytes((pb, 1), jnp.float32))
    cost_a = pl.CostEstimate(
        flops=int(2 * pb * vp * emb + 2 * pb * k_pad * vp + 2 * pb * emb * k_pad),
        transcendentals=int(n_branches * pb * vp + pb * k_pad),
        bytes_accessed=int(bytes_a))

    bytes_b = (nbytes((k_pad, vp), jnp.bfloat16) + 2 * nbytes((1, vp), jnp.float32)
               + nbytes((pb, k_pad), jnp.bfloat16) + 4 * nbytes((pb, 1), jnp.float32)
               + nbytes((pb, vp), jnp.bfloat16))
    cost_b = pl.CostEstimate(
        flops=int(2 * pb * k_pad * vp),
        transcendentals=int(n_branches * pb * vp),
        bytes_accessed=int(bytes_b))

    # ----- explicit scoped-VMEM budget (tiles double-buffered + residents) ---
    tile_bytes = (nbytes((pb, tv), x_dtype) + nbytes((tv, emb), jnp.bfloat16)
                  + nbytes((k_pad, tv), jnp.bfloat16) + 2 * nbytes((1, tv), jnp.float32)
                  + nbytes((pb, tv), jnp.bfloat16))
    resident_bytes = (nbytes((pb, k_pad), jnp.bfloat16) + nbytes((emb, k_pad), jnp.bfloat16)
                      + nbytes((pb, emb), jnp.float32) + nbytes((pb, k_pad), jnp.float32)
                      + 8 * nbytes((pb, 1), jnp.float32)
                      + 2 * nbytes((1, emb), jnp.float32) + 2 * nbytes((1, k_pad), jnp.float32))
    # NOTE: choose vocab_tile so this stays inside the generation's VMEM
    # (v7x: 64 MiB physical -> keep vocab_tile <= ~1024 at batch 512).
    vmem_limit = int(max(2 * (2 * tile_bytes + resident_bytes), 32 * 1024 * 1024))

    # ------------------------------ Pass A -----------------------------------
    alpha_pad, m_eta, l_eta, m_bn, l_bn = pl.pallas_call(
        partial(_encoder_stats_kernel, n_valid=batch, anneal=anneal),
        out_shape=(jax.ShapeDtypeStruct((pb, k_pad), jnp.float32),   # alpha_pos
                   jax.ShapeDtypeStruct((pb, 1), jnp.float32),       # m_eta
                   jax.ShapeDtypeStruct((pb, 1), jnp.float32),       # l_eta
                   jax.ShapeDtypeStruct((pb, 1), jnp.float32),       # m_bn
                   jax.ShapeDtypeStruct((pb, 1), jnp.float32)),      # l_bn
        grid_spec=pltpu.PrefetchScalarGridSpec(
            num_scalar_prefetch=0, grid=(n_tiles,),
            in_specs=[
                pl.BlockSpec((pb, tv), cols_map),          # x tile
                pl.BlockSpec((tv, emb), lambda j: (j, 0)), # w_emb tile
                pl.BlockSpec((k_pad, tv), cols_map),       # w_eta tile
                pl.BlockSpec((1, tv), cols_map),           # b_eta tile
                pl.BlockSpec((1, tv), cols_map),           # dec_bn_beta tile
                pl.BlockSpec((pb, k_pad), const_map),      # z (resident)
                pl.BlockSpec((1, emb), const_map),         # b_emb
                pl.BlockSpec((emb, k_pad), const_map),     # w_alpha
                pl.BlockSpec((1, k_pad), const_map),       # b_alpha
                pl.BlockSpec((1, k_pad), const_map),       # enc_bn_beta
            ],
            out_specs=(pl.BlockSpec((pb, k_pad), const_map),
                       pl.BlockSpec((pb, 1), const_map),
                       pl.BlockSpec((pb, 1), const_map),
                       pl.BlockSpec((pb, 1), const_map),
                       pl.BlockSpec((pb, 1), const_map)),
            scratch_shapes=[pltpu.VMEM((pb, emb), jnp.float32)]),
        compiler_params=pltpu.CompilerParams(
            dimension_semantics=("arbitrary",),            # vocab reduction
            vmem_limit_bytes=vmem_limit),
        cost_estimate=cost_a,
    )(x_p, w_emb_p, w_eta_p, b_eta_p, dec_beta_p, z_p,
      params["b_emb"], params["w_alpha"], params["b_alpha"], params["enc_bn_beta"])

    # ------------------------------ Pass B -----------------------------------
    x_recon_pad = pl.pallas_call(
        partial(_decoder_write_kernel, n_valid=batch, anneal=anneal),
        out_shape=jax.ShapeDtypeStruct((pb, vp), jnp.bfloat16),      # bf16 output
        grid_spec=pltpu.PrefetchScalarGridSpec(
            num_scalar_prefetch=0, grid=(n_tiles,),
            in_specs=[
                pl.BlockSpec((pb, k_pad), const_map),      # z (resident)
                pl.BlockSpec((k_pad, tv), cols_map),       # w_eta tile
                pl.BlockSpec((1, tv), cols_map),           # b_eta tile
                pl.BlockSpec((1, tv), cols_map),           # dec_bn_beta tile
                pl.BlockSpec((pb, 1), const_map),          # m_eta
                pl.BlockSpec((pb, 1), const_map),          # l_eta
                pl.BlockSpec((pb, 1), const_map),          # m_bn
                pl.BlockSpec((pb, 1), const_map),          # l_bn
            ],
            out_specs=pl.BlockSpec((pb, tv), cols_map)),
        compiler_params=pltpu.CompilerParams(
            dimension_semantics=("parallel",),             # independent vocab tiles
            vmem_limit_bytes=vmem_limit),
        cost_estimate=cost_b,
    )(z_p, w_eta_p, b_eta_p, dec_beta_p, m_eta, l_eta, m_bn, l_bn)

    return alpha_pad[:batch, :num_topics], x_recon_pad[:batch, :vocab]


# ----------------------------------------------------------------------------
# Parameters (PyTorch Linear defaults), weights pre-transposed to [in, out],
# stored bf16; biases / BN betas f32; topic axis padded to 128 lanes.
# ----------------------------------------------------------------------------
def make_params(key, vocab_size, num_topics, embeddings_dim):
    k_pad = _round_up(num_topics, _LANES)
    ks = jax.random.split(key, 3)

    def lin(k, fan_in, fan_out, pad_out=0, pad_in=0):
        bound = 1.0 / (fan_in ** 0.5)
        kw, kb = jax.random.split(k)
        w = jax.random.uniform(kw, (fan_in, fan_out), jnp.float32, -bound, bound)
        b = jax.random.uniform(kb, (1, fan_out), jnp.float32, -bound, bound)
        w = jnp.pad(w, ((0, pad_in), (0, pad_out)))
        b = jnp.pad(b, ((0, 0), (0, pad_out)))
        return w.astype(jnp.bfloat16), b

    w_emb, b_emb = lin(ks[0], vocab_size, embeddings_dim)                         # embedding_layer
    w_alpha, b_alpha = lin(ks[1], embeddings_dim, num_topics,
                           pad_out=k_pad - num_topics)                            # alpha_layer
    w_eta, b_eta = lin(ks[2], num_topics, vocab_size, pad_in=k_pad - num_topics)  # eta_layer
    # TODO(synk): softmax_beta=True (LinearSoftmax weight softmax) variant not implemented.

    return dict(
        w_emb=w_emb, b_emb=b_emb,
        w_alpha=w_alpha, b_alpha=b_alpha,
        enc_bn_beta=jnp.zeros((1, k_pad), jnp.float32),      # gamma frozen at 1 (folded)
        w_eta=w_eta, b_eta=b_eta,
        dec_bn_beta=jnp.zeros((1, vocab_size), jnp.float32), # gamma frozen at 1 (folded)
    )


# ----------------------------------------------------------------------------
# Pure-JAX f32 reference of Encoder.forward + Decoder.forward (for validation)
# ----------------------------------------------------------------------------
def reference_forward(params, x, z_prior, num_topics, anneal):
    hp = jax.lax.Precision.HIGHEST
    f32 = jnp.float32
    w_emb = params["w_emb"].astype(f32)
    w_alpha = params["w_alpha"].astype(f32)[:, :num_topics]
    w_eta = params["w_eta"].astype(f32)[:num_topics, :]

    def bn(v, beta):
        mean = jnp.mean(v, axis=0, keepdims=True)
        var = jnp.mean((v - mean) ** 2, axis=0, keepdims=True)
        return (v - mean) * jax.lax.rsqrt(var + _BN_EPS) + beta

    embedded = jax.nn.relu(jnp.dot(x, w_emb, precision=hp) + params["b_emb"])
    alpha = jnp.dot(embedded, w_alpha, precision=hp) + params["b_alpha"][:, :num_topics]
    alpha_pos = jnp.maximum(
        jax.nn.softplus(bn(alpha, params["enc_bn_beta"][:, :num_topics])), 1e-5)

    eta = jnp.dot(z_prior, w_eta, precision=hp) + params["b_eta"]
    eta_bn = bn(eta, params["dec_bn_beta"])
    x_recon = (anneal * jax.nn.softmax(eta, axis=-1)
               + (1.0 - anneal) * jax.nn.softmax(eta_bn, axis=-1))
    return alpha_pos, x_recon


# ----------------------------------------------------------------------------
# VariationalAutoencoder.forward
# ----------------------------------------------------------------------------
def vae_forward(params, x, key, num_topics, alpha_prior,
                bn_annealing_factor=1.0, kl_annealing_factor=1.0,
                vocab_tile=512, x_int8=True):
    """Mirrors VariationalAutoencoder.forward.  Returns
    (x_recon bf16, alpha_pos f32, z_guide f32, z_prior f32)."""
    del kl_annealing_factor  # only scales pyro log-prob accumulation; no tensor output
    batch = x.shape[0]
    k_guide, k_prior = jax.random.split(key)

    # second plate prior: z ~ Dirichlet(alpha_0) feeding the decoder
    alpha_0 = jnp.full((batch, num_topics), alpha_prior, jnp.float32)
    z_prior = jax.random.dirichlet(k_prior, alpha_0)

    alpha_pos, x_recon = vae_pallas_forward(params, x, z_prior, num_topics,
                                            bn_annealing_factor,
                                            vocab_tile=vocab_tile, x_int8=x_int8)

    # first plate: pyro.sample('doc_topics', Dirichlet(encoder(x)))
    z_guide = jax.random.dirichlet(k_guide, alpha_pos)
    # pyro.sample('obs', CollapsedMultinomial(1, probs=x_recon), obs=x):
    # observed site -> log-prob scoring only, no tensor output.
    return x_recon, alpha_pos, z_guide, z_prior


if __name__ == "__main__":
    # Small shapes consistent with the module; vocab=640 with vocab_tile=256
    # exercises a 3-step vocab grid including a partially padded last tile.
    batch = 8
    vocab_size = 640
    num_topics = 32
    embeddings_dim = 128
    alpha_prior = 0.02
    bn_anneal = 0.25       # fractional -> both softmax branches are exercised
    dropout = 0.0          # Dropout(p=0.0) -> identity, matched exactly in-kernel

    root = jax.random.PRNGKey(0)
    k_params, k_data, k_sample = jax.random.split(root, 3)

    params = make_params(k_params, vocab_size, num_topics, embeddings_dim)
    # bag-of-words style non-negative count matrix (small counts -> int8-exact)
    x = jax.random.poisson(k_data, 0.5, (batch, vocab_size)).astype(jnp.float32)

    fwd = jax.jit(partial(vae_forward,
                          num_topics=num_topics,
                          alpha_prior=alpha_prior,
                          bn_annealing_factor=bn_anneal,
                          kl_annealing_factor=1.0,
                          vocab_tile=256,
                          x_int8=True))
    x_recon, alpha_pos, z_guide, z_prior = fwd(params, x, k_sample)
    jax.block_until_ready((x_recon, alpha_pos, z_guide, z_prior))

    assert x_recon.shape == (batch, vocab_size)
    assert alpha_pos.shape == (batch, num_topics)
    assert z_guide.shape == (batch, num_topics)

    x_recon_f32 = x_recon.astype(jnp.float32)
    assert bool(jnp.all(jnp.isfinite(x_recon_f32)))
    assert bool(jnp.all(jnp.isfinite(alpha_pos)))
    assert bool(jnp.all(alpha_pos >= 9.9e-6))                       # softplus clamp at 1e-5
    # each row of x_recon is a convex blend of softmaxes -> sums to ~1
    # (approx reciprocal + bf16 output -> relaxed tolerance)
    assert bool(jnp.allclose(jnp.sum(x_recon_f32, axis=-1), 1.0, atol=2e-2))
    assert bool(jnp.allclose(jnp.sum(z_guide, axis=-1), 1.0, atol=1e-3))

    # pure-JAX f32 reference check (same z_prior, same bf16 parameter values)
    ref_alpha, ref_xrecon = reference_forward(params, x, z_prior, num_topics, bn_anneal)
    assert bool(jnp.allclose(alpha_pos, ref_alpha, atol=1e-2, rtol=1e-2))
    assert bool(jnp.allclose(x_recon_f32, ref_xrecon, atol=5e-4, rtol=5e-2))

    print("KERNEL_OK")
</pallas_src>

<mosaic_0001>
module attributes {stable_mosaic.version = 11 : i64} {
  func.func @_encoder_stats_kernel(%arg0: i32, %arg1: memref<32x256xi8, #tpu.memory_space<vmem>>, %arg2: memref<256x128xbf16, #tpu.memory_space<vmem>>, %arg3: memref<128x256xbf16, #tpu.memory_space<vmem>>, %arg4: memref<1x256xf32, #tpu.memory_space<vmem>>, %arg5: memref<1x256xf32, #tpu.memory_space<vmem>>, %arg6: memref<32x128xbf16, #tpu.memory_space<vmem>>, %arg7: memref<1x128xf32, #tpu.memory_space<vmem>>, %arg8: memref<128x128xbf16, #tpu.memory_space<vmem>>, %arg9: memref<1x128xf32, #tpu.memory_space<vmem>>, %arg10: memref<1x128xf32, #tpu.memory_space<vmem>>, %arg11: memref<32x128xf32, #tpu.memory_space<vmem>>, %arg12: memref<32x1xf32, #tpu.memory_space<vmem>>, %arg13: memref<32x1xf32, #tpu.memory_space<vmem>>, %arg14: memref<32x1xf32, #tpu.memory_space<vmem>>, %arg15: memref<32x1xf32, #tpu.memory_space<vmem>>, %arg16: memref<32x128xf32, #tpu.memory_space<vmem>>) attributes {dimension_semantics = [#tpu.dimension_semantics<arbitrary>], iteration_bounds = array<i64: 3>, scalar_prefetch = 0 : i64, scratch_operands = 1 : i64, tpu.core_type = #tpu.core_type<tc>, window_params = [{transform_indices = @transform_0, window_bounds = array<i64: 32, 256>}, {transform_indices = @transform_1, window_bounds = array<i64: 256, 128>}, {transform_indices = @transform_2, window_bounds = array<i64: 128, 256>}, {transform_indices = @transform_3, window_bounds = array<i64: 1, 256>}, {transform_indices = @transform_4, window_bounds = array<i64: 1, 256>}, {pipeline_mode = #tpu.pipeline_mode<synchronous>, transform_indices = @transform_5, window_bounds = array<i64: 32, 128>}, {pipeline_mode = #tpu.pipeline_mode<synchronous>, transform_indices = @transform_6, window_bounds = array<i64: 1, 128>}, {pipeline_mode = #tpu.pipeline_mode<synchronous>, transform_indices = @transform_7, window_bounds = array<i64: 128, 128>}, {pipeline_mode = #tpu.pipeline_mode<synchronous>, transform_indices = @transform_8, window_bounds = array<i64: 1, 128>}, {pipeline_mode = #tpu.pipeline_mode<synchronous>, transform_indices = @transform_9, window_bounds = array<i64: 1, 128>}, {pipeline_mode = #tpu.pipeline_mode<synchronous>, transform_indices = @transform_10, window_bounds = array<i64: 32, 128>}, {pipeline_mode = #tpu.pipeline_mode<synchronous>, transform_indices = @transform_11, window_bounds = array<i64: 32, 1>}, {pipeline_mode = #tpu.pipeline_mode<synchronous>, transform_indices = @transform_12, window_bounds = array<i64: 32, 1>}, {pipeline_mode = #tpu.pipeline_mode<synchronous>, transform_indices = @transform_13, window_bounds = array<i64: 32, 1>}, {pipeline_mode = #tpu.pipeline_mode<synchronous>, transform_indices = @transform_14, window_bounds = array<i64: 32, 1>}]} {
    %0 = tpu.iota {dimensions = array<i32: 0>} : vector<32x1xi32>
    %c8_i32 = arith.constant 8 : i32
    %1 = vector.broadcast %c8_i32 : i32 to vector<32x1xi32>
    %2 = arith.cmpi slt, %0, %1 : vector<32x1xi32>
    %3 = arith.extui %2 : vector<32x1xi1> to vector<32x1xi32>
    %4 = arith.sitofp %3 : vector<32x1xi32> to vector<32x1xf32>
    %c0_i32 = arith.constant 0 : i32
    %5 = arith.cmpi eq, %arg0, %c0_i32 : i32
    %6 = arith.extui %5 : i1 to i32
    %c0_i32_0 = arith.constant 0 : i32
    %7 = arith.cmpi ne, %6, %c0_i32_0 : i32
    scf.if %7 {
      %cst_44 = arith.constant 0.000000e+00 : f32
      %79 = vector.broadcast %cst_44 : f32 to vector<32x128xf32>
      %c0_45 = arith.constant 0 : index
      %c0_46 = arith.constant 0 : index
      %80 = vector.load %arg16[%c0_45, %c0_46] : memref<32x128xf32, #tpu.memory_space<vmem>>, vector<32x128xf32>
      tpu.vector_store %arg16[%c0_45, %c0_46], %79 {strides = array<i32>} : memref<32x128xf32, #tpu.memory_space<vmem>>, vector<32x128xf32>,
      %cst_47 = arith.constant 0xFF800000 : f32
      %81 = vector.broadcast %cst_47 : f32 to vector<32x1xf32>
      %c0_48 = arith.constant 0 : index
      %c0_49 = arith.constant 0 : index
      %82 = vector.load %arg12[%c0_48, %c0_49] : memref<32x1xf32, #tpu.memory_space<vmem>>, vector<32x1xf32>
      tpu.vector_store %arg12[%c0_48, %c0_49], %81 {strides = array<i32>} : memref<32x1xf32, #tpu.memory_space<vmem>>, vector<32x1xf32>,
      %cst_50 = arith.constant 0.000000e+00 : f32
      %83 = vector.broadcast %cst_50 : f32 to vector<32x1xf32>
      %c0_51 = arith.constant 0 : index
      %c0_52 = arith.constant 0 : index
      %84 = vector.load %arg13[%c0_51, %c0_52] : memref<32x1xf32, #tpu.memory_space<vmem>>, vector<32x1xf32>
      tpu.vector_store %arg13[%c0_51, %c0_52], %83 {strides = array<i32>} : memref<32x1xf32, #tpu.memory_space<vmem>>, vector<32x1xf32>,
      %cst_53 = arith.constant 0xFF800000 : f32
      %85 = vector.broadcast %cst_53 : f32 to vector<32x1xf32>
      %c0_54 = arith.constant 0 : index
      %c0_55 = arith.constant 0 : index
      %86 = vector.load %arg14[%c0_54, %c0_55] : memref<32x1xf32, #tpu.memory_space<vmem>>, vector<32x1xf32>
      tpu.vector_store %arg14[%c0_54, %c0_55], %85 {strides = array<i32>} : memref<32x1xf32, #tpu.memory_space<vmem>>, vector<32x1xf32>,
      %cst_56 = arith.constant 0.000000e+00 : f32
      %87 = vector.broadcast %cst_56 : f32 to vector<32x1xf32>
      %c0_57 = arith.constant 0 : index
      %c0_58 = arith.constant 0 : index
      %88 = vector.load %arg15[%c0_57, %c0_58] : memref<32x1xf32, #tpu.memory_space<vmem>>, vector<32x1xf32>
      tpu.vector_store %arg15[%c0_57, %c0_58], %87 {strides = array<i32>} : memref<32x1xf32, #tpu.memory_space<vmem>>, vector<32x1xf32>,
    } else {
    }
    %c0 = arith.constant 0 : index
    %c0_1 = arith.constant 0 : index
    %8 = vector.load %arg1[%c0, %c0_1] : memref<32x256xi8, #tpu.memory_space<vmem>>, vector<32x256xi8>
    %9 = arith.sitofp %8 : vector<32x256xi8> to vector<32x256xbf16>
    %c0_2 = arith.constant 0 : index
    %c0_3 = arith.constant 0 : index
    %10 = vector.load %arg16[%c0_2, %c0_3] : memref<32x128xf32, #tpu.memory_space<vmem>>, vector<32x128xf32>
    %c0_4 = arith.constant 0 : index
    %c0_5 = arith.constant 0 : index
    %11 = vector.load %arg2[%c0_4, %c0_5] : memref<256x128xbf16, #tpu.memory_space<vmem>>, vector<256x128xbf16>
    %cst = arith.constant dense<0.000000e+00> : vector<32x128xf32>
    %12 = tpu.matmul %9, %11, %cst {dimension_numbers = #tpu.dot_dimension_numbers<[1], [0], [0], [1], [0, 0, 1, 1], [], []>} : vector<32x256xbf16>, vector<256x128xbf16>, vector<32x128xf32> -> vector<32x128xf32>
    %13 = arith.addf %10, %12 : vector<32x128xf32>
    %c0_6 = arith.constant 0 : index
    %c0_7 = arith.constant 0 : index
    %14 = vector.load %arg16[%c0_6, %c0_7] : memref<32x128xf32, #tpu.memory_space<vmem>>, vector<32x128xf32>
    tpu.vector_store %arg16[%c0_6, %c0_7], %13 {strides = array<i32>} : memref<32x128xf32, #tpu.memory_space<vmem>>, vector<32x128xf32>,
    %c0_8 = arith.constant 0 : index
    %c0_9 = arith.constant 0 : index
    %15 = vector.load %arg6[%c0_8, %c0_9] : memref<32x128xbf16, #tpu.memory_space<vmem>>, vector<32x128xbf16>
    %c0_10 = arith.constant 0 : index
    %c0_11 = arith.constant 0 : index
    %16 = vector.load %arg3[%c0_10, %c0_11] : memref<128x256xbf16, #tpu.memory_space<vmem>>, vector<128x256xbf16>
    %cst_12 = arith.constant dense<0.000000e+00> : vector<32x256xf32>
    %17 = tpu.matmul %15, %16, %cst_12 {dimension_numbers = #tpu.dot_dimension_numbers<[1], [0], [0], [1], [0, 0, 1, 1], [], []>} : vector<32x128xbf16>, vector<128x256xbf16>, vector<32x256xf32> -> vector<32x256xf32>
    %c0_13 = arith.constant 0 : index
    %c0_14 = arith.constant 0 : index
    %18 = vector.load %arg4[%c0_13, %c0_14] : memref<1x256xf32, #tpu.memory_space<vmem>>, vector<1x256xf32>
    %19 = vector.broadcast %18 : vector<1x256xf32> to vector<32x256xf32>
    %20 = arith.addf %17, %19 : vector<32x256xf32>
    %c0_15 = arith.constant 0 : index
    %c0_16 = arith.constant 0 : index
    %21 = vector.load %arg12[%c0_15, %c0_16] : memref<32x1xf32, #tpu.memory_space<vmem>>, vector<32x1xf32>
    %cst_17 = arith.constant dense<0xFF800000> : vector<32xf32>
    %22 = vector.multi_reduction <maximumf>, %20, %cst_17 [1] : vector<32x256xf32> to vector<32xf32>
    %23 = vector.shape_cast %22 : vector<32xf32> to vector<32x1xf32>
    %24 = arith.maximumf %21, %23 : vector<32x1xf32>
    %c0_18 = arith.constant 0 : index
    %c0_19 = arith.constant 0 : index
    %25 = vector.load %arg13[%c0_18, %c0_19] : memref<32x1xf32, #tpu.memory_space<vmem>>, vector<32x1xf32>
    %26 = arith.subf %21, %24 : vector<32x1xf32>
    %27 = math.exp %26 : vector<32x1xf32>
    %28 = arith.mulf %25, %27 : vector<32x1xf32>
    %29 = vector.broadcast %24 : vector<32x1xf32> to vector<32x256xf32>
    %30 = arith.subf %20, %29 : vector<32x256xf32>
    %31 = math.exp %30 : vector<32x256xf32>
    %cst_20 = arith.constant dense<0.000000e+00> : vector<32xf32>
    %32 = vector.multi_reduction <add>, %31, %cst_20 [1] : vector<32x256xf32> to vector<32xf32>
    %33 = vector.shape_cast %32 : vector<32xf32> to vector<32x1xf32>
    %34 = arith.addf %28, %33 : vector<32x1xf32>
    %c0_21 = arith.constant 0 : index
    %c0_22 = arith.constant 0 : index
    %35 = vector.load %arg13[%c0_21, %c0_22] : memref<32x1xf32, #tpu.memory_space<vmem>>, vector<32x1xf32>
    tpu.vector_store %arg13[%c0_21, %c0_22], %34 {strides = array<i32>} : memref<32x1xf32, #tpu.memory_space<vmem>>, vector<32x1xf32>,
    %c0_23 = arith.constant 0 : index
    %c0_24 = arith.constant 0 : index
    %36 = vector.load %arg12[%c0_23, %c0_24] : memref<32x1xf32, #tpu.memory_space<vmem>>, vector<32x1xf32>
    tpu.vector_store %arg12[%c0_23, %c0_24], %24 {strides = array<i32>} : memref<32x1xf32, #tpu.memory_space<vmem>>, vector<32x1xf32>,
    %c0_25 = arith.constant 0 : index
    %c0_26 = arith.constant 0 : index
    %37 = vector.load %arg5[%c0_25, %c0_26] : memref<1x256xf32, #tpu.memory_space<vmem>>, vector<1x256xf32>
    %38 = vector.broadcast %4 : vector<32x1xf32> to vector<32x256xf32>
    %39 = arith.mulf %20, %38 : vector<32x256xf32>
    %cst_27 = arith.constant dense<0.000000e+00> : vector<256xf32>
    %40 = vector.multi_reduction <add>, %39, %cst_27 [0] : vector<32x256xf32> to vector<256xf32>
    %41 = vector.shape_cast %40 : vector<256xf32> to vector<1x256xf32>
    %cst_28 = arith.constant 1.250000e-01 : f32
    %42 = vector.broadcast %cst_28 : f32 to vector<1x256xf32>
    %43 = arith.mulf %41, %42 : vector<1x256xf32>
    %44 = vector.broadcast %43 : vector<1x256xf32> to vector<32x256xf32>
    %45 = arith.subf %20, %44 : vector<32x256xf32>
    %46 = arith.mulf %45, %45 : vector<32x256xf32>
    %47 = vector.broadcast %4 : vector<32x1xf32> to vector<32x256xf32>
    %48 = arith.mulf %46, %47 : vector<32x256xf32>
    %cst_29 = arith.constant dense<0.000000e+00> : vector<256xf32>
    %49 = vector.multi_reduction <add>, %48, %cst_29 [0] : vector<32x256xf32> to vector<256xf32>
    %50 = vector.shape_cast %49 : vector<256xf32> to vector<1x256xf32>
    %cst_30 = arith.constant 1.250000e-01 : f32
    %51 = vector.broadcast %cst_30 : f32 to vector<1x256xf32>
    %52 = arith.mulf %50, %51 : vector<1x256xf32>
    %cst_31 = arith.constant 1.000000e-03 : f32
    %53 = vector.broadcast %cst_31 : f32 to vector<1x256xf32>
    %54 = arith.addf %52, %53 : vector<1x256xf32>
    %55 = math.rsqrt %54 : vector<1x256xf32>
    %56 = vector.broadcast %55 : vector<1x256xf32> to vector<32x256xf32>
    %57 = arith.mulf %45, %56 : vector<32x256xf32>
    %58 = vector.broadcast %37 : vector<1x256xf32> to vector<32x256xf32>
    %59 = arith.addf %57, %58 : vector<32x256xf32>
    %c0_32 = arith.constant 0 : index
    %c0_33 = arith.constant 0 : index
    %60 = vector.load %arg14[%c0_32, %c0_33] : memref<32x1xf32, #tpu.memory_space<vmem>>, vector<32x1xf32>
    %cst_34 = arith.constant dense<0xFF800000> : vector<32xf32>
    %61 = vector.multi_reduction <maximumf>, %59, %cst_34 [1] : vector<32x256xf32> to vector<32xf32>
    %62 = vector.shape_cast %61 : vector<32xf32> to vector<32x1xf32>
    %63 = arith.maximumf %60, %62 : vector<32x1xf32>
    %c0_35 = arith.constant 0 : index
    %c0_36 = arith.constant 0 : index
    %64 = vector.load %arg15[%c0_35, %c0_36] : memref<32x1xf32, #tpu.memory_space<vmem>>, vector<32x1xf32>
    %65 = arith.subf %60, %63 : vector<32x1xf32>
    %66 = math.exp %65 : vector<32x1xf32>
    %67 = arith.mulf %64, %66 : vector<32x1xf32>
    %68 = vector.broadcast %63 : vector<32x1xf32> to vector<32x256xf32>
    %69 = arith.subf %59, %68 : vector<32x256xf32>
    %70 = math.exp %69 : vector<32x256xf32>
    %cst_37 = arith.constant dense<0.000000e+00> : vector<32xf32>
    %71 = vector.multi_reduction <add>, %70, %cst_37 [1] : vector<32x256xf32> to vector<32xf32>
    %72 = vector.shape_cast %71 : vector<32xf32> to vector<32x1xf32>
    %73 = arith.addf %67, %72 : vector<32x1xf32>
    %c0_38 = arith.constant 0 : index
    %c0_39 = arith.constant 0 : index
    %74 = vector.load %arg15[%c0_38, %c0_39] : memref<32x1xf32, #tpu.memory_space<vmem>>, vector<32x1xf32>
    tpu.vector_store %arg15[%c0_38, %c0_39], %73 {strides = array<i32>} : memref<32x1xf32, #tpu.memory_space<vmem>>, vector<32x1xf32>,
    %c0_40 = arith.constant 0 : index
    %c0_41 = arith.constant 0 : index
    %75 = vector.load %arg14[%c0_40, %c0_41] : memref<32x1xf32, #tpu.memory_space<vmem>>, vector<32x1xf32>
    tpu.vector_store %arg14[%c0_40, %c0_41], %63 {strides = array<i32>} : memref<32x1xf32, #tpu.memory_space<vmem>>, vector<32x1xf32>,
    %c2_i32 = arith.constant 2 : i32
    %76 = arith.cmpi eq, %arg0, %c2_i32 : i32
    %77 = arith.extui %76 : i1 to i32
    %cst_42 = arith.constant 1.250000e-01 : f32
    %c0_i32_43 = arith.constant 0 : i32
    %78 = arith.cmpi ne, %77, %c0_i32_43 : i32
    scf.if %78 {
      %c0_44 = arith.constant 0 : index
      %c0_45 = arith.constant 0 : index
      %79 = vector.load %arg16[%c0_44, %c0_45] : memref<32x128xf32, #tpu.memory_space<vmem>>, vector<32x128xf32>
      %c0_46 = arith.constant 0 : index
      %c0_47 = arith.constant 0 : index
      %80 = vector.load %arg7[%c0_46, %c0_47] : memref<1x128xf32, #tpu.memory_space<vmem>>, vector<1x128xf32>
      %81 = vector.broadcast %80 : vector<1x128xf32> to vector<32x128xf32>
      %82 = arith.addf %79, %81 : vector<32x128xf32>
      %cst_48 = arith.constant 0.000000e+00 : f32
      %83 = vector.broadcast %cst_48 : f32 to vector<32x128xf32>
      %84 = arith.maximumf %82, %83 : vector<32x128xf32>
      %c0_49 = arith.constant 0 : index
      %c0_50 = arith.constant 0 : index
      %85 = vector.load %arg8[%c0_49, %c0_50] : memref<128x128xbf16, #tpu.memory_space<vmem>>, vector<128x128xbf16>
      %86 = arith.extf %85 : vector<128x128xbf16> to vector<128x128xf32>
      %cst_51 = arith.constant dense<0.000000e+00> : vector<32x128xf32>
      %87 = tpu.matmul %84, %86, %cst_51 {dimension_numbers = #tpu.dot_dimension_numbers<[1], [0], [0], [1], [0, 0, 1, 1], [], []>} : vector<32x128xf32>, vector<128x128xf32>, vector<32x128xf32> -> vector<32x128xf32>
      %c0_52 = arith.constant 0 : index
      %c0_53 = arith.constant 0 : index
      %88 = vector.load %arg9[%c0_52, %c0_53] : memref<1x128xf32, #tpu.memory_space<vmem>>, vector<1x128xf32>
      %89 = vector.broadcast %88 : vector<1x128xf32> to vector<32x128xf32>
      %90 = arith.addf %87, %89 : vector<32x128xf32>
      %c0_54 = arith.constant 0 : index
      %c0_55 = arith.constant 0 : index
      %91 = vector.load %arg10[%c0_54, %c0_55] : memref<1x128xf32, #tpu.memory_space<vmem>>, vector<1x128xf32>
      %92 = vector.broadcast %4 : vector<32x1xf32> to vector<32x128xf32>
      %93 = arith.mulf %90, %92 : vector<32x128xf32>
      %cst_56 = arith.constant dense<0.000000e+00> : vector<128xf32>
      %94 = vector.multi_reduction <add>, %93, %cst_56 [0] : vector<32x128xf32> to vector<128xf32>
      %95 = vector.shape_cast %94 : vector<128xf32> to vector<1x128xf32>
      %96 = vector.broadcast %cst_42 : f32 to vector<1x128xf32>
      %97 = arith.mulf %95, %96 : vector<1x128xf32>
      %98 = vector.broadcast %97 : vector<1x128xf32> to vector<32x128xf32>
      %99 = arith.subf %90, %98 : vector<32x128xf32>
      %100 = arith.mulf %99, %99 : vector<32x128xf32>
      %101 = vector.broadcast %4 : vector<32x1xf32> to vector<32x128xf32>
      %102 = arith.mulf %100, %101 : vector<32x128xf32>
      %cst_57 = arith.constant dense<0.000000e+00> : vector<128xf32>
      %103 = vector.multi_reduction <add>, %102, %cst_57 [0] : vector<32x128xf32> to vector<128xf32>
      %104 = vector.shape_cast %103 : vector<128xf32> to vector<1x128xf32>
      %105 = vector.broadcast %cst_42 : f32 to vector<1x128xf32>
      %106 = arith.mulf %104, %105 : vector<1x128xf32>
      %cst_58 = arith.constant 1.000000e-03 : f32
      %107 = vector.broadcast %cst_58 : f32 to vector<1x128xf32>
      %108 = arith.addf %106, %107 : vector<1x128xf32>
      %109 = math.rsqrt %108 : vector<1x128xf32>
      %110 = vector.broadcast %109 : vector<1x128xf32> to vector<32x128xf32>
      %111 = arith.mulf %99, %110 : vector<32x128xf32>
      %112 = vector.broadcast %91 : vector<1x128xf32> to vector<32x128xf32>
      %113 = arith.addf %111, %112 : vector<32x128xf32>
      %cst_59 = arith.constant 0.000000e+00 : f32
      %114 = vector.broadcast %cst_59 : f32 to vector<32x128xf32>
      %115 = arith.maximumf %113, %114 : vector<32x128xf32>
      %116 = vector.broadcast %cst_59 : f32 to vector<32x128xf32>
      %117 = arith.subf %113, %116 : vector<32x128xf32>
      %118 = arith.cmpf one, %117, %117 : vector<32x128xf32>
      %119 = vector.broadcast %cst_59 : f32 to vector<32x128xf32>
      %120 = arith.addf %113, %119 : vector<32x128xf32>
      %121 = math.absf %117 : vector<32x128xf32>
      %cst_60 = arith.constant 0.000000e+00 : f32
      %122 = vector.broadcast %cst_60 : f32 to vector<32x128xf32>
      %123 = arith.subf %122, %121 : vector<32x128xf32>
      %124 = math.exp %123 : vector<32x128xf32>
      %125 = math.log1p %124 : vector<32x128xf32>
      %126 = arith.addf %115, %125 : vector<32x128xf32>
      %127 = arith.select %118, %120, %126 : vector<32x128xi1>, vector<32x128xf32>
      %cst_61 = arith.constant 9.99999974E-6 : f32
      %128 = vector.broadcast %cst_61 : f32 to vector<32x128xf32>
      %129 = arith.maximumf %127, %128 : vector<32x128xf32>
      %c0_62 = arith.constant 0 : index
      %c0_63 = arith.constant 0 : index
      %130 = vector.load %arg11[%c0_62, %c0_63] : memref<32x128xf32, #tpu.memory_space<vmem>>, vector<32x128xf32>
      tpu.vector_store %arg11[%c0_62, %c0_63], %129 {strides = array<i32>} : memref<32x128xf32, #tpu.memory_space<vmem>>, vector<32x128xf32>,
    } else {
    }
    return
  }
  func.func @transform_0(%arg0: i32) -> (i32, i32) {
    %c0_i32 = arith.constant 0 : i32
    %c0_i32_0 = arith.constant 0 : i32
    return %c0_i32, %arg0 : i32, i32
  }
  func.func @transform_1(%arg0: i32) -> (i32, i32) {
    %c0_i32 = arith.constant 0 : i32
    %c0_i32_0 = arith.constant 0 : i32
    return %arg0, %c0_i32 : i32, i32
  }
  func.func @transform_2(%arg0: i32) -> (i32, i32) {
    %c0_i32 = arith.constant 0 : i32
    %c0_i32_0 = arith.constant 0 : i32
    return %c0_i32, %arg0 : i32, i32
  }
  func.func @transform_3(%arg0: i32) -> (i32, i32) {
    %c0_i32 = arith.constant 0 : i32
    %c0_i32_0 = arith.constant 0 : i32
    return %c0_i32, %arg0 : i32, i32
  }
  func.func @transform_4(%arg0: i32) -> (i32, i32) {
    %c0_i32 = arith.constant 0 : i32
    %c0_i32_0 = arith.constant 0 : i32
    return %c0_i32, %arg0 : i32, i32
  }
  func.func @transform_5(%arg0: i32) -> (i32, i32) {
    %c0_i32 = arith.constant 0 : i32
    %c0_i32_0 = arith.constant 0 : i32
    %c0_i32_1 = arith.constant 0 : i32
    return %c0_i32, %c0_i32_0 : i32, i32
  }
  func.func @transform_6(%arg0: i32) -> (i32, i32) {
    %c0_i32 = arith.constant 0 : i32
    %c0_i32_0 = arith.constant 0 : i32
    %c0_i32_1 = arith.constant 0 : i32
    return %c0_i32, %c0_i32_0 : i32, i32
  }
  func.func @transform_7(%arg0: i32) -> (i32, i32) {
    %c0_i32 = arith.constant 0 : i32
    %c0_i32_0 = arith.constant 0 : i32
    %c0_i32_1 = arith.constant 0 : i32
    return %c0_i32, %c0_i32_0 : i32, i32
  }
  func.func @transform_8(%arg0: i32) -> (i32, i32) {
    %c0_i32 = arith.constant 0 : i32
    %c0_i32_0 = arith.constant 0 : i32
    %c0_i32_1 = arith.constant 0 : i32
    return %c0_i32, %c0_i32_0 : i32, i32
  }
  func.func @transform_9(%arg0: i32) -> (i32, i32) {
    %c0_i32 = arith.constant 0 : i32
    %c0_i32_0 = arith.constant 0 : i32
    %c0_i32_1 = arith.constant 0 : i32
    return %c0_i32, %c0_i32_0 : i32, i32
  }
  func.func @transform_10(%arg0: i32) -> (i32, i32) {
    %c0_i32 = arith.constant 0 : i32
    %c0_i32_0 = arith.constant 0 : i32
    %c0_i32_1 = arith.constant 0 : i32
    return %c0_i32, %c0_i32_0 : i32, i32
  }
  func.func @transform_11(%arg0: i32) -> (i32, i32) {
    %c0_i32 = arith.constant 0 : i32
    %c0_i32_0 = arith.constant 0 : i32
    %c0_i32_1 = arith.constant 0 : i32
    return %c0_i32, %c0_i32_0 : i32, i32
  }
  func.func @transform_12(%arg0: i32) -> (i32, i32) {
    %c0_i32 = arith.constant 0 : i32
    %c0_i32_0 = arith.constant 0 : i32
    %c0_i32_1 = arith.constant 0 : i32
    return %c0_i32, %c0_i32_0 : i32, i32
  }
  func.func @transform_13(%arg0: i32) -> (i32, i32) {
    %c0_i32 = arith.constant 0 : i32
    %c0_i32_0 = arith.constant 0 : i32
    %c0_i32_1 = arith.constant 0 : i32
    return %c0_i32, %c0_i32_0 : i32, i32
  }
  func.func @transform_14(%arg0: i32) -> (i32, i32) {
    %c0_i32 = arith.constant 0 : i32
    %c0_i32_0 = arith.constant 0 : i32
    %c0_i32_1 = arith.constant 0 : i32
    return %c0_i32, %c0_i32_0 : i32, i32
  }
}

module attributes {stable_mosaic.version = 11 : i64} {
  func.func @_decoder_write_kernel(%arg0: i32, %arg1: memref<32x128xbf16, #tpu.memory_space<vmem>>, %arg2: memref<128x256xbf16, #tpu.memory_space<vmem>>, %arg3: memref<1x256xf32, #tpu.memory_space<vmem>>, %arg4: memref<1x256xf32, #tpu.memory_space<vmem>>, %arg5: memref<32x1xf32, #tpu.memory_space<vmem>>, %arg6: memref<32x1xf32, #tpu.memory_space<vmem>>, %arg7: memref<32x1xf32, #tpu.memory_space<vmem>>, %arg8: memref<32x1xf32, #tpu.memory_space<vmem>>, %arg9: memref<32x256xbf16, #tpu.memory_space<vmem>>) attributes {dimension_semantics = [#tpu.dimension_semantics<parallel>], iteration_bounds = array<i64: 3>, scalar_prefetch = 0 : i64, scratch_operands = 0 : i64, tpu.core_type = #tpu.core_type<tc>, window_params = [{pipeline_mode = #tpu.pipeline_mode<synchronous>, transform_indices = @transform_0, window_bounds = array<i64: 32, 128>}, {transform_indices = @transform_1, window_bounds = array<i64: 128, 256>}, {transform_indices = @transform_2, window_bounds = array<i64: 1, 256>}, {transform_indices = @transform_3, window_bounds = array<i64: 1, 256>}, {pipeline_mode = #tpu.pipeline_mode<synchronous>, transform_indices = @transform_4, window_bounds = array<i64: 32, 1>}, {pipeline_mode = #tpu.pipeline_mode<synchronous>, transform_indices = @transform_5, window_bounds = array<i64: 32, 1>}, {pipeline_mode = #tpu.pipeline_mode<synchronous>, transform_indices = @transform_6, window_bounds = array<i64: 32, 1>}, {pipeline_mode = #tpu.pipeline_mode<synchronous>, transform_indices = @transform_7, window_bounds = array<i64: 32, 1>}, {transform_indices = @transform_8, window_bounds = array<i64: 32, 256>}]} {
    %0 = tpu.iota {dimensions = array<i32: 0>} : vector<32x1xi32>
    %c8_i32 = arith.constant 8 : i32
    %1 = vector.broadcast %c8_i32 : i32 to vector<32x1xi32>
    %2 = arith.cmpi slt, %0, %1 : vector<32x1xi32>
    %3 = arith.extui %2 : vector<32x1xi1> to vector<32x1xi32>
    %4 = arith.sitofp %3 : vector<32x1xi32> to vector<32x1xf32>
    %c0 = arith.constant 0 : index
    %c0_0 = arith.constant 0 : index
    %5 = vector.load %arg1[%c0, %c0_0] : memref<32x128xbf16, #tpu.memory_space<vmem>>, vector<32x128xbf16>
    %c0_1 = arith.constant 0 : index
    %c0_2 = arith.constant 0 : index
    %6 = vector.load %arg2[%c0_1, %c0_2] : memref<128x256xbf16, #tpu.memory_space<vmem>>, vector<128x256xbf16>
    %cst = arith.constant dense<0.000000e+00> : vector<32x256xf32>
    %7 = tpu.matmul %5, %6, %cst {dimension_numbers = #tpu.dot_dimension_numbers<[1], [0], [0], [1], [0, 0, 1, 1], [], []>} : vector<32x128xbf16>, vector<128x256xbf16>, vector<32x256xf32> -> vector<32x256xf32>
    %c0_3 = arith.constant 0 : index
    %c0_4 = arith.constant 0 : index
    %8 = vector.load %arg3[%c0_3, %c0_4] : memref<1x256xf32, #tpu.memory_space<vmem>>, vector<1x256xf32>
    %9 = vector.broadcast %8 : vector<1x256xf32> to vector<32x256xf32>
    %10 = arith.addf %7, %9 : vector<32x256xf32>
    %c0_5 = arith.constant 0 : index
    %c0_6 = arith.constant 0 : index
    %11 = vector.load %arg5[%c0_5, %c0_6] : memref<32x1xf32, #tpu.memory_space<vmem>>, vector<32x1xf32>
    %12 = vector.broadcast %11 : vector<32x1xf32> to vector<32x256xf32>
    %13 = arith.subf %10, %12 : vector<32x256xf32>
    %14 = math.exp %13 : vector<32x256xf32>
    %c0_7 = arith.constant 0 : index
    %c0_8 = arith.constant 0 : index
    %15 = vector.load %arg6[%c0_7, %c0_8] : memref<32x1xf32, #tpu.memory_space<vmem>>, vector<32x1xf32>
    %16 = tpu.reciprocal %15 {approx = true} : vector<32x1xf32> -> vector<32x1xf32>
    %17 = vector.broadcast %16 : vector<32x1xf32> to vector<32x256xf32>
    %18 = arith.mulf %14, %17 : vector<32x256xf32>
    %cst_9 = arith.constant 2.500000e-01 : f32
    %19 = vector.broadcast %cst_9 : f32 to vector<32x256xf32>
    %20 = arith.mulf %19, %18 : vector<32x256xf32>
    %c0_10 = arith.constant 0 : index
    %c0_11 = arith.constant 0 : index
    %21 = vector.load %arg4[%c0_10, %c0_11] : memref<1x256xf32, #tpu.memory_space<vmem>>, vector<1x256xf32>
    %22 = vector.broadcast %4 : vector<32x1xf32> to vector<32x256xf32>
    %23 = arith.mulf %10, %22 : vector<32x256xf32>
    %cst_12 = arith.constant dense<0.000000e+00> : vector<256xf32>
    %24 = vector.multi_reduction <add>, %23, %cst_12 [0] : vector<32x256xf32> to vector<256xf32>
    %25 = vector.shape_cast %24 : vector<256xf32> to vector<1x256xf32>
    %cst_13 = arith.constant 1.250000e-01 : f32
    %26 = vector.broadcast %cst_13 : f32 to vector<1x256xf32>
    %27 = arith.mulf %25, %26 : vector<1x256xf32>
    %28 = vector.broadcast %27 : vector<1x256xf32> to vector<32x256xf32>
    %29 = arith.subf %10, %28 : vector<32x256xf32>
    %30 = arith.mulf %29, %29 : vector<32x256xf32>
    %31 = vector.broadcast %4 : vector<32x1xf32> to vector<32x256xf32>
    %32 = arith.mulf %30, %31 : vector<32x256xf32>
    %cst_14 = arith.constant dense<0.000000e+00> : vector<256xf32>
    %33 = vector.multi_reduction <add>, %32, %cst_14 [0] : vector<32x256xf32> to vector<256xf32>
    %34 = vector.shape_cast %33 : vector<256xf32> to vector<1x256xf32>
    %cst_15 = arith.constant 1.250000e-01 : f32
    %35 = vector.broadcast %cst_15 : f32 to vector<1x256xf32>
    %36 = arith.mulf %34, %35 : vector<1x256xf32>
    %cst_16 = arith.constant 1.000000e-03 : f32
    %37 = vector.broadcast %cst_16 : f32 to vector<1x256xf32>
    %38 = arith.addf %36, %37 : vector<1x256xf32>
    %39 = math.rsqrt %38 : vector<1x256xf32>
    %40 = vector.broadcast %39 : vector<1x256xf32> to vector<32x256xf32>
    %41 = arith.mulf %29, %40 : vector<32x256xf32>
    %42 = vector.broadcast %21 : vector<1x256xf32> to vector<32x256xf32>
    %43 = arith.addf %41, %42 : vector<32x256xf32>
    %c0_17 = arith.constant 0 : index
    %c0_18 = arith.constant 0 : index
    %44 = vector.load %arg7[%c0_17, %c0_18] : memref<32x1xf32, #tpu.memory_space<vmem>>, vector<32x1xf32>
    %45 = vector.broadcast %44 : vector<32x1xf32> to vector<32x256xf32>
    %46 = arith.subf %43, %45 : vector<32x256xf32>
    %47 = math.exp %46 : vector<32x256xf32>
    %c0_19 = arith.constant 0 : index
    %c0_20 = arith.constant 0 : index
    %48 = vector.load %arg8[%c0_19, %c0_20] : memref<32x1xf32, #tpu.memory_space<vmem>>, vector<32x1xf32>
    %49 = tpu.reciprocal %48 {approx = true} : vector<32x1xf32> -> vector<32x1xf32>
    %50 = vector.broadcast %49 : vector<32x1xf32> to vector<32x256xf32>
    %51 = arith.mulf %47, %50 : vector<32x256xf32>
    %cst_21 = arith.constant 7.500000e-01 : f32
    %52 = vector.broadcast %cst_21 : f32 to vector<32x256xf32>
    %53 = arith.mulf %52, %51 : vector<32x256xf32>
    %54 = arith.addf %20, %53 : vector<32x256xf32>
    %55 = arith.truncf %54 : vector<32x256xf32> to vector<32x256xbf16>
    %c0_22 = arith.constant 0 : index
    %c0_23 = arith.constant 0 : index
    %56 = vector.load %arg9[%c0_22, %c0_23] : memref<32x256xbf16, #tpu.memory_space<vmem>>, vector<32x256xbf16>
    tpu.vector_store %arg9[%c0_22, %c0_23], %55 {strides = array<i32>} : memref<32x256xbf16, #tpu.memory_space<vmem>>, vector<32x256xbf16>,
    return
  }
  func.func @transform_0(%arg0: i32) -> (i32, i32) {
    %c0_i32 = arith.constant 0 : i32
    %c0_i32_0 = arith.constant 0 : i32
    %c0_i32_1 = arith.constant 0 : i32
    return %c0_i32, %c0_i32_0 : i32, i32
  }
  func.func @transform_1(%arg0: i32) -> (i32, i32) {
    %c0_i32 = arith.constant 0 : i32
    %c0_i32_0 = arith.constant 0 : i32
    return %c0_i32, %arg0 : i32, i32
  }
  func.func @transform_2(%arg0: i32) -> (i32, i32) {
    %c0_i32 = arith.constant 0 : i32
    %c0_i32_0 = arith.constant 0 : i32
    return %c0_i32, %arg0 : i32, i32
  }
  func.func @transform_3(%arg0: i32) -> (i32, i32) {
    %c0_i32 = arith.constant 0 : i32
    %c0_i32_0 = arith.constant 0 : i32
    return %c0_i32, %arg0 : i32, i32
  }
  func.func @transform_4(%arg0: i32) -> (i32, i32) {
    %c0_i32 = arith.constant 0 : i32
    %c0_i32_0 = arith.constant 0 : i32
    %c0_i32_1 = arith.constant 0 : i32
    return %c0_i32, %c0_i32_0 : i32, i32
  }
  func.func @transform_5(%arg0: i32) -> (i32, i32) {
    %c0_i32 = arith.constant 0 : i32
    %c0_i32_0 = arith.constant 0 : i32
    %c0_i32_1 = arith.constant 0 : i32
    return %c0_i32, %c0_i32_0 : i32, i32
  }
  func.func @transform_6(%arg0: i32) -> (i32, i32) {
    %c0_i32 = arith.constant 0 : i32
    %c0_i32_0 = arith.constant 0 : i32
    %c0_i32_1 = arith.constant 0 : i32
    return %c0_i32, %c0_i32_0 : i32, i32
  }
  func.func @transform_7(%arg0: i32) -> (i32, i32) {
    %c0_i32 = arith.constant 0 : i32
    %c0_i32_0 = arith.constant 0 : i32
    %c0_i32_1 = arith.constant 0 : i32
    return %c0_i32, %c0_i32_0 : i32, i32
  }
  func.func @transform_8(%arg0: i32) -> (i32, i32) {
    %c0_i32 = arith.constant 0 : i32
    %c0_i32_0 = arith.constant 0 : i32
    return %c0_i32, %arg0 : i32, i32
  }
}

</mosaic_0001>

<bundles_post_ra>
// kernel: vae_forward.3
= control target key start
LH: loop header
LB: loop body
LE: loop exit
PB: predicated region body
PF: predicated region fallthrough
CT: control target
= control target key end

     0   :  { %s1320_s27 = smov 0   ;;  %s1322_s28 = smov 0   ;;  %s1577_s0 = inlined_call_operand.vmem [shape: bf16[32,128], index: 0, kind: input, shape index: {}]   ;;  %s1578_s1 = inlined_call_operand.vmem [shape: bf16[128,768], index: 1, kind: input, shape index: {}]   ;;  %s1579_s2 = inlined_call_operand.vmem [shape: f32[1,768], index: 2, kind: input, shape index: {}]   ;;  %s1580_s3 = inlined_call_operand.vmem [shape: f32[1,768], index: 3, kind: input, shape index: {}]   ;;  %s1581_s4 = inlined_call_operand.vmem [shape: f32[32,1], index: 4, kind: input, shape index: {}]   ;;  %s1582_s5 = inlined_call_operand.vmem [shape: f32[32,1], index: 5, kind: input, shape index: {}]   ;;  %s1583_s6 = inlined_call_operand.vmem [shape: f32[32,1], index: 6, kind: input, shape index: {}]   ;;  %s1584_s7 = inlined_call_operand.vmem [shape: f32[32,1], index: 7, kind: input, shape index: {}]   ;;  %s1585_s8 = inlined_call_operand.vmem [shape: bf16[32,768], index: 8, kind: output, shape index: {}]  }
   0x1   :  { %s1324_s29 = smov 0  }
   0x2 LB: > { %s1336_s30 = sadd.s32 4294967295, %s1272_s29   ;;  %s1339_s9 = sadd.s32 1, %s1272_s29   ;;  %s1272_s29 = sphi %s1324_s29, %s1589_s29   ;;  %s1268_s28 = sphi %s1322_s28, %s1588_s28   ;;  %s1264_s27 = sphi %s1320_s27, %s1587_s27  }
   0x3   : > { %s43_s10 = ssub.s32 %s1272_s29, %s1339_s9  ;;  %s46_s11 = sadd.s32 1, %s1268_s28 }
   0x4   : > { %p44_p0 = scmp.eq.s32.totalorder %s43_s10, 0  ;;  %p53_p1 = scmp.ne.s32.totalorder %s1268_s28, %s1264_s27 }
   0x5   : > { %p54_p2 = scmp.eq.s32.totalorder %s1272_s29, 0  ;;  %p219_p3 = scmp.eq.s32.totalorder %s1336_s30, 2 }
   0x6   : > { %s1349_s12 = scalar_select %p44_p0, %s1268_s28, %s46_s11  }
   0x7   : > { %p55_p4 = por %p54_p2, %p53_p1  ;;  %p1351_p5 = por %p219_p3, %p53_p1 }
   0x8   : > { %p1087_p6 = scmp.ge.s32.totalorder %s1272_s29, 3 }
   0xa   : > { %256 = sbr.rel (%p1087_p6) target bundleno = 27 (0x1b), region = 36 }
   0xf   : > { %259 = sbr.rel (!%p55_p4) target bundleno = 27 (0x1b), region = 40  ;;  %s261_s14 = sand.u32 (%p55_p4), 1, %s1268_s28  }
  0x10   : > { %s1123_s15 = sshll.u32 (%p55_p4), %s1272_s29, 3  ;;  %s1088_s16 = sshll.u32 (%p55_p4), %s261_s14, 7 }
  0x11   : > { %s1361_s19 = scalar_lea.vmem (%p55_p4), %s1578_s1, %s1123_s15  ;;  %s263_s20 = scalar_lea.vmem (%p55_p4), [#allocation2], %s1088_s16 }
  0x12   : > { %v325_v0 = vld [vmem:[%s1361_s19] sm:$0xff] (%p55_p4)  ;;  %v327_v1 = vld [vmem:[%s1361_s19 + $0x18] sm:$0xff] (%p55_p4)  ;;  %v329_v2 = vld [vmem:[%s1361_s19 + $0x30] sm:$0xff] (%p55_p4) }
  0x13   : > { %326 = vst [vmem:[%s263_s20] sm:$0xff] (%p55_p4), %v325_v0  ;;  %328 = vst [vmem:[%s263_s20 + $0x8] sm:$0xff] (%p55_p4), %v327_v1  ;;  %v331_v3 = vld [vmem:[%s1361_s19 + $0x48] sm:$0xff] (%p55_p4)  ;;  %v333_v4 = vld [vmem:[%s1361_s19 + $0x60] sm:$0xff] (%p55_p4) }
  0x14   : > { %330 = vst [vmem:[%s263_s20 + $0x10] sm:$0xff] %v329_v2  ;;  %v335_v5 = vld [vmem:[%s1361_s19 + $0x78] sm:$0xff]  ;;  %332 = vst [vmem:[%s263_s20 + $0x18] sm:$0xff] %v331_v3  ;;  %v337_v6 = vld [vmem:[%s1361_s19 + $0x90] sm:$0xff] }
  0x15   : > { %334 = vst [vmem:[%s263_s20 + $0x20] sm:$0xff] %v333_v4  ;;  %336 = vst [vmem:[%s263_s20 + $0x28] sm:$0xff] %v335_v5  ;;  %v339_v7 = vld [vmem:[%s1361_s19 + $0xa8] sm:$0xff]  ;;  %v341_v8 = vld [vmem:[%s1361_s19 + $0xc0] sm:$0xff] }
  0x16   : > { %338 = vst [vmem:[%s263_s20 + $0x30] sm:$0xff] %v337_v6  ;;  %340 = vst [vmem:[%s263_s20 + $0x38] sm:$0xff] %v339_v7  ;;  %v343_v9 = vld [vmem:[%s1361_s19 + $0xd8] sm:$0xff]  ;;  %v345_v10 = vld [vmem:[%s1361_s19 + $0xf0] sm:$0xff] }
  0x17   : > { %342 = vst [vmem:[%s263_s20 + $0x40] sm:$0xff] %v341_v8  ;;  %v347_v11 = vld [vmem:[%s1361_s19 + $0x108] sm:$0xff]  ;;  %344 = vst [vmem:[%s263_s20 + $0x48] sm:$0xff] %v343_v9  ;;  %v349_v12 = vld [vmem:[%s1361_s19 + $0x120] sm:$0xff] }
  0x18   : > { %346 = vst [vmem:[%s263_s20 + $0x50] sm:$0xff] %v345_v10  ;;  %348 = vst [vmem:[%s263_s20 + $0x58] sm:$0xff] %v347_v11  ;;  %v351_v13 = vld [vmem:[%s1361_s19 + $0x138] sm:$0xff]  ;;  %v353_v14 = vld [vmem:[%s1361_s19 + $0x150] sm:$0xff] }
  0x19   : > { %350 = vst [vmem:[%s263_s20 + $0x60] sm:$0xff] %v349_v12  ;;  %352 = vst [vmem:[%s263_s20 + $0x68] sm:$0xff] %v351_v13  ;;  %v355_v15 = vld [vmem:[%s1361_s19 + $0x168] sm:$0xff] }
  0x1a   : > { %354 = vst [vmem:[%s263_s20 + $0x70] sm:$0xff] %v353_v14  ;;  %356 = vst [vmem:[%s263_s20 + $0x78] sm:$0xff] %v355_v15 }
  0x1b PF: > { %p1091_p7 = scmp.ge.s32.totalorder %s1272_s29, 1  ;;  %p377_p8 = scmp.lt.s32.totalorder %s1272_s29, 4 }
  0x1d   : > { %p378_p9 = pnand %p1091_p7, %p377_p8 }
  0x1e   : > { %s384_s21 = sand.u32 (!%p378_p9), 1, %s1264_s27  }
  0x1f   : > { %381 = sbr.rel (%p378_p9) target bundleno = 381 (0x17d), region = 86  ;;  %s1092_s22 = sshll.u32 (!%p378_p9), %s384_s21, 7 }
  0x20   : > { %s1390_s29 = scalar_lea.vmem (!%p378_p9), [#allocation2], %s1092_s22  ;;  %s1093_s23 = sshll.u32 (!%p378_p9), %s384_s21, 5 }
  0x21   : > { %s423_s27 = scalar_lea.vmem (!%p378_p9), [#allocation3], %s1093_s23 }
  0x24   : > { %v1274_v16 = vmov 0   ;;  %v633_v17 = vld [vmem:[%s1581_s4 + $0x10] sm:$0xff]  ;;  %v631_v18 = vld [vmem:[%s1581_s4] sm:$0xff]  ;;  %v634_v26 = vld [vmem:[%s1581_s4 + $0x18] sm:$0xff]  ;;  %v476_v59 = vlaneseq  ;;  %s1128_s21 = sshll.u32 (%p1351_p5), %s1336_s30, 3 }
  0x25   : > { %610 = vmatprep.mubr.bf16.mxu0 %v1274_v16  ;;  %620 = vmatprep.mubr.bf16.mxu1 %v1274_v16  ;;  %v1172_v19 = vld [vmem:[%s1390_s29 + $0x74] ss:$8 sps:$4 sm:$0xff]   ;;  %v1174_v20 = vld [vmem:[%s1390_s29 + $0x70] ss:$8 sps:$4 sm:$0xff]   ;;  %v1175_v21 = vld [vmem:[%s1390_s29 + $0x64] ss:$8 sps:$4 sm:$0xff]   ;;  %s964_s26 = scalar_lea.vmem (%p1351_p5), %s1585_s8, %s1128_s21 }
  0x26   : > { %1171 = vset.pattern.permute.xlu1 %v1274_v16  ;;  %1170 = vset.pattern.permute.xlu0 %v1274_v16  ;;  %v1177_v22 = vld [vmem:[%s1390_s29 + $0x60] ss:$8 sps:$4 sm:$0xff]   ;;  %v1178_v23 = vld [vmem:[%s1390_s29 + $0x54] ss:$8 sps:$4 sm:$0xff]   ;;  %v1180_v24 = vld [vmem:[%s1390_s29 + $0x50] ss:$8 sps:$4 sm:$0xff]  }
  0x27   : > { %647 = vperm.xlu1 %1171, %v633_v17   ;;  %637 = vperm.xlu0 %1170, %v631_v18   ;;  %v1181_v25 = vld [vmem:[%s1390_s29 + $0x44] ss:$8 sps:$4 sm:$0xff]   ;;  %v1183_v27 = vld [vmem:[%s1390_s29 + $0x40] ss:$8 sps:$4 sm:$0xff]   ;;  %v1184_v29 = vld [vmem:[%s1390_s29 + $0x34] ss:$8 sps:$4 sm:$0xff]  }
  0x28   : > { %578 = vmatprep.subr.bf16.mxu0 %v1172_v19  ;;  %1129 = vmatprep.subr.bf16.mxu1 %v1172_v19  ;;  %v632_v28 = vld [vmem:[%s1581_s4 + $0x8] sm:$0xff]  ;;  %v679_v31 = vld [vmem:[%s1582_s5] sm:$0xff]  ;;  %v682_v32 = vld [vmem:[%s1582_s5 + $0x18] sm:$0xff]  ;;  %v1459_v60 = vshrl.u32 %v476_v59, 7 }
  0x29   : > { %579 = vmatpush1.bf16.msra.mxu0 %v1174_v20  ;;  %1137 = vmatpush1.bf16.msra.mxu1 %v1174_v20  ;;  %v680_v30 = vld [vmem:[%s1582_s5 + $0x8] sm:$0xff]  ;;  %v827_v34 = vld [vmem:[%s1583_s6] sm:$0xff]  ;;  %v681_v35 = vld [vmem:[%s1582_s5 + $0x10] sm:$0xff] }
  0x2a   : > { %580 = vmatprep.subr.bf16.mxu0 %v1175_v21  ;;  %1130 = vmatprep.subr.bf16.mxu1 %v1175_v21  ;;  %1198 = vrcp.f32 %v680_v30  ;;  %v828_v33 = vld [vmem:[%s1583_s6 + $0x8] sm:$0xff]  ;;  %v1186_v36 = vld [vmem:[%s1390_s29 + $0x30] ss:$8 sps:$4 sm:$0xff]   ;;  %v875_v41 = vld [vmem:[%s1584_s7] sm:$0xff]  ;;  %v478_v61 = vsub.s32 0, %v1459_v60  ;;  %v482_v1 = vsub.s32 1, %v1459_v60 }
  0x2b   : > { %652 = vperm.xlu1 %1171, %v634_v26   ;;  %642 = vperm.xlu0 %1170, %v632_v28   ;;  %1200 = vrcp.f32 %v679_v31  ;;  %v1187_v37 = vld [vmem:[%s1390_s29 + $0x24] ss:$8 sps:$4 sm:$0xff]   ;;  %v830_v39 = vld [vmem:[%s1583_s6 + $0x18] sm:$0xff]  ;;  %v829_v40 = vld [vmem:[%s1583_s6 + $0x10] sm:$0xff] }
  0x2c   : > { %1202 = vrcp.f32 %v682_v32  ;;  %v876_v38 = vld [vmem:[%s1584_s7 + $0x8] sm:$0xff]  ;;  %v1190_v43 = vld [vmem:[%s1390_s29 + $0x14] ss:$8 sps:$4 sm:$0xff]   ;;  %v1192_v46 = vld [vmem:[%s1390_s29 + $0x10] ss:$8 sps:$4 sm:$0xff]  }
  0x2d   : > { %581 = vmatpush1.bf16.msra.mxu0 %v1177_v22  ;;  %1138 = vmatpush1.bf16.msra.mxu1 %v1177_v22  ;;  %1204 = vrcp.f32 %v681_v35  ;;  %v1189_v42 = vld [vmem:[%s1390_s29 + $0x20] ss:$8 sps:$4 sm:$0xff]   ;;  %v878_v44 = vld [vmem:[%s1584_s7 + $0x18] sm:$0xff]  ;;  %v877_v45 = vld [vmem:[%s1584_s7 + $0x10] sm:$0xff] }
  0x2e   : > { %582 = vmatprep.subr.bf16.mxu0 %v1178_v23  ;;  %1131 = vmatprep.subr.bf16.mxu1 %v1178_v23  ;;  %1206 = vrcp.f32 %v876_v38  ;;  %v1193_v47 = vld [vmem:[%s1390_s29 + $0x4] ss:$8 sps:$4 sm:$0xff]   ;;  %v1195_v50 = vld [vmem:[%s1390_s29] ss:$8 sps:$4 sm:$0xff]   ;;  %s1094_s29 = sshll.u32 %s1336_s30, 1 }
  0x2f   : > { %838 = vperm.xlu1 %1171, %v828_v33   ;;  %833 = vperm.xlu0 %1170, %v827_v34   ;;  %1208 = vrcp.f32 %v875_v41  ;;  %v1196_v53 = vld [vmem:[%s1577_s0] sm:$0xff]   ;;  %v1197_v54 = vld [vmem:[%s1577_s0 + $0x8] sm:$0xff]   ;;  %p426_p10 = scmp.lt.s32.totalorder %s1094_s29, 5 }
  0x30   : > { %1210 = vrcp.f32 %v878_v44 }
  0x31   : > { %583 = vmatpush1.bf16.msra.mxu0 %v1180_v24  ;;  %1139 = vmatpush1.bf16.msra.mxu1 %v1180_v24  ;;  %1212 = vrcp.f32 %v877_v45  ;;  %s1591_s29 = smov (!%p426_p10, %s1094_s29), 5 }
  0x32   : > { %584 = vmatprep.subr.bf16.mxu0 %v1181_v25  ;;  %1132 = vmatprep.subr.bf16.mxu1 %v1181_v25  ;;  %s428_s18 = scalar_lea.vmem %s1579_s2, %s1591_s29  ;;  %s433_s22 = scalar_lea.vmem %s1580_s3, %s1591_s29 }
  0x33   : > { %848 = vperm.xlu1 %1171, %v830_v39   ;;  %843 = vperm.xlu0 %1170, %v829_v40   ;;  %v474_v62 = vld [vmem:[%s428_s18] sm:$0x3] }
  0x34   : > { %v479_v4 = vrot.slane %v474_v62, %v478_v61  ;;  %v483_v9 = vrot.slane %v474_v62, %v482_v1 }
  0x35   : > { %585 = vmatpush1.bf16.msra.mxu0 %v1183_v27  ;;  %1140 = vmatpush1.bf16.msra.mxu1 %v1183_v27 }
  0x36   : > { %586 = vmatprep.subr.bf16.mxu0 %v1184_v29  ;;  %1133 = vmatprep.subr.bf16.mxu1 %v1184_v29 }
  0x37   : > { %v1199_v48 = vpop.eup %1198 }
  0x38   : > { %v1201_v49 = vpop.eup %1200  ;;  %694 = vperm.xlu1 %1171, %v1199_v48  }
  0x39   : > { %587 = vmatpush1.bf16.msra.mxu0 %v1186_v36  ;;  %1141 = vmatpush1.bf16.msra.mxu1 %v1186_v36  ;;  %v1203_v51 = vpop.eup %1202 }
  0x3a   : > { %588 = vmatprep.subr.bf16.mxu0 %v1187_v37  ;;  %1134 = vmatprep.subr.bf16.mxu1 %v1187_v37  ;;  %v1205_v52 = vpop.eup %1204 }
  0x3b   : > { %689 = vperm.xlu0 %1170, %v1201_v49   ;;  %v1207_v55 = vpop.eup %1206 }
  0x3c   : > { %704 = vperm.xlu1 %1171, %v1203_v51   ;;  %v1209_v56 = vpop.eup %1208 }
  0x3d   : > { %589 = vmatpush1.bf16.msra.mxu0 %v1189_v42  ;;  %1142 = vmatpush1.bf16.msra.mxu1 %v1189_v42  ;;  %v1211_v57 = vpop.eup %1210 }
  0x3e   : > { %590 = vmatprep.subr.bf16.mxu0 %v1190_v43  ;;  %1135 = vmatprep.subr.bf16.mxu1 %v1190_v43  ;;  %v1213_v58 = vpop.eup %1212 }
  0x3f   : > { %699 = vperm.xlu0 %1170, %v1205_v52  }
  0x40   : > { %890 = vperm.xlu1 %1171, %v1207_v55  }
  0x41   : > { %591 = vmatpush1.bf16.msra.mxu0 %v1192_v46  ;;  %1143 = vmatpush1.bf16.msra.mxu1 %v1192_v46 }
  0x42   : > { %592 = vmatprep.subr.bf16.mxu0 %v1193_v47  ;;  %1136 = vmatprep.subr.bf16.mxu1 %v1193_v47 }
  0x43   : > { %885 = vperm.xlu0 %1170, %v1209_v56  }
  0x44   : > { %900 = vperm.xlu1 %1171, %v1211_v57  }
  0x45   : > { %593 = vmatpush1.bf16.msra.mxu0 %v1195_v50  ;;  %1144 = vmatpush1.bf16.msra.mxu1 %v1195_v50 }
  0x47   : > { %895 = vperm.xlu0 %1170, %v1213_v58  }
  0x48   : > { %611 = vmatmul.mubr.bf16.vlgmr.msra.gmra.mxu0 %v1196_v53  ;;  %621 = vmatmul.mubr.bf16.vlgmr.msra.gmra.mxu1 %v1197_v54 }
 0x108   : > { %v612_v63 = vpop.f32.mrf.mxu0  ;;  %v622_v0 = vpop.f32.mrf.mxu1 }
 0x109   : > { %v1469_v7 = vadd.f32 %v622_v0, %v479_v4  ;;  %v1475_v11 = vadd.f32 %v612_v63, %v479_v4 }
 0x10a   : > { %v614_v2 = vpop.f32.mrf.mxu0  ;;  %v624_v3 = vpop.f32.mrf.mxu1 }
 0x10b   : > { %v728_v15 = vmul.f32 0.0, %v1469_v7  ;;  %v1481_v16 = vadd.f32 %v624_v3, %v483_v9  ;;  %v1486_v19 = vadd.f32 %v614_v2, %v483_v9 }
 0x10c   : > { %v616_v5 = vpop.f32.mrf.mxu0  ;;  %v626_v6 = vpop.f32.mrf.mxu1 }
 0x10d   : > { %v1471_v8 = vadd.f32 %v616_v5, %v479_v4  ;;  %v1478_v13 = vadd.f32 %v626_v6, %v479_v4  ;;  %v729_v24 = vmul.f32 0.0, %v1481_v16 }
 0x10e   : > { %v618_v10 = vpop.f32.mrf.mxu0  ;;  %v628_v14 = vpop.f32.mrf.mxu1 }
 0x10f   : > { %v726_v12 = vmul.f32 0.0, %v1471_v8  ;;  %v1484_v18 = vadd.f32 %v618_v10, %v483_v9  ;;  %v730_v20 = vmul.f32 0.0, %v1478_v13  ;;  %v1490_v23 = vadd.f32 %v628_v14, %v483_v9 }
 0x111   : > { %v732_v17 = vadd.f32 %v726_v12, %v1475_v11  ;;  %v727_v22 = vmul.f32 0.0, %v1484_v18  ;;  %v731_v28 = vmul.f32 0.0, %v1490_v23 }
 0x113   : > { %v733_v21 = vadd.f32 %v732_v17, %v728_v15  ;;  %v741_v26 = vadd.f32 %v727_v22, %v1486_v19 }
 0x115   : > { %v734_v25 = vadd.f32 %v733_v21, %v730_v20  ;;  %v742_v29 = vadd.f32 %v741_v26, %v729_v24 }
 0x117   : > { %v735_v27 = vrot.slane %v734_v25, 4  ;;  %v743_v31 = vadd.f32 %v742_v29, %v731_v28  ;;  %v638_v29 = vpop.permute.xlu0 %637 }
 0x119   : > { %v736_v30 = vadd.f32 %v735_v27, %v734_v25  ;;  %v744_v33 = vrot.slane %v743_v31, 4 }
 0x11b   : > { %v737_v32 = vrot.slane %v736_v30, 2  ;;  %v745_v35 = vadd.f32 %v744_v33, %v743_v31  ;;  %v648_v31 = vpop.permute.xlu1 %647 }
 0x11d   : > { %v738_v34 = vadd.f32 %v737_v32, %v736_v30  ;;  %v746_v37 = vrot.slane %v745_v35, 2 }
 0x11f   : > { %v739_v36 = vrot.slane %v738_v34, 1  ;;  %v747_v39 = vadd.f32 %v746_v37, %v745_v35  ;;  %v655_v37 = vsub.f32 %v1475_v11, %v638_v29 }
 0x121   : > { %v740_v38 = vadd.f32 %v739_v36, %v738_v34  ;;  %v748_v41 = vrot.slane %v747_v39, 1  ;;  %v659_v36 = vsub.f32 %v1469_v7, %v648_v31 }
 0x123   : > { %v750_v40 = vmul.f32 0.125, %v740_v38  ;;  %v749_v42 = vadd.f32 %v748_v41, %v747_v39  ;;  %v643_v38 = vpop.permute.xlu0 %642  ;;  %v653_v41 = vpop.permute.xlu1 %652 }
 0x125   : > { %v1496_v43 = vsub.f32 %v1471_v8, %v750_v40  ;;  %v1499_v44 = vsub.f32 %v1478_v13, %v750_v40  ;;  %v1502_v45 = vsub.f32 %v1475_v11, %v750_v40  ;;  %v1505_v46 = vsub.f32 %v1469_v7, %v750_v40 }
 0x126   : > { %v751_v47 = vmul.f32 0.125, %v749_v42  ;;  %v656_v40 = vsub.f32 %v1486_v19, %v638_v29  ;;  %v660_v42 = vsub.f32 %v1481_v16, %v648_v31  ;;  %v658_v11 = vsub.f32 %v1484_v18, %v643_v38 }
 0x127   : > { %v762_v48 = vmul.f32 %v1496_v43, %v1496_v43  ;;  %v764_v49 = vmul.f32 %v1505_v46, %v1505_v46  ;;  %v766_v53 = vmul.f32 %v1499_v44, %v1499_v44  ;;  %v760_v55 = vmul.f32 %v1502_v45, %v1502_v45 }
 0x128   : > { %v1512_v50 = vsub.f32 %v1490_v23, %v751_v47  ;;  %v1515_v51 = vsub.f32 %v1486_v19, %v751_v47  ;;  %v1518_v52 = vsub.f32 %v1484_v18, %v751_v47  ;;  %v1523_v54 = vsub.f32 %v1481_v16, %v751_v47 }
 0x129   : > { %v770_v56 = vmul.f32 0.0, %v762_v48  ;;  %v772_v59 = vmul.f32 0.0, %v764_v49  ;;  %v774_v3 = vmul.f32 0.0, %v766_v53  ;;  %v671_v47 = vmul.f32 1.442695, %v659_v36 }
 0x12a   : > { %v763_v57 = vmul.f32 %v1518_v52, %v1518_v52  ;;  %v765_v58 = vmul.f32 %v1523_v54, %v1523_v54  ;;  %v767_v63 = vmul.f32 %v1512_v50, %v1512_v50  ;;  %v761_v0 = vmul.f32 %v1515_v51, %v1515_v51 }
 0x12b   : > { %v776_v62 = vadd.f32 %v770_v56, %v760_v55  ;;  %v657_v48 = vsub.f32 %v1471_v8, %v643_v38  ;;  %v663_v49 = vmul.f32 1.442695, %v655_v37  ;;  %v661_v53 = vsub.f32 %v1478_v13, %v653_v41 }
 0x12c   : > { %v771_v2 = vmul.f32 0.0, %v763_v57  ;;  %v773_v5 = vmul.f32 0.0, %v765_v58  ;;  %v775_v10 = vmul.f32 0.0, %v767_v63  ;;  %v665_v55 = vmul.f32 1.442695, %v656_v40  ;;  %v839_v57 = vpop.permute.xlu1 %838  ;;  %v834_v63 = vpop.permute.xlu0 %833 }
 0x12d   : > { %v777_v4 = vadd.f32 %v776_v62, %v772_v59  ;;  %v673_v7 = vmul.f32 1.442695, %v660_v42  ;;  %v667_v19 = vmul.f32 1.442695, %v657_v48  ;;  %v675_v56 = vmul.f32 1.442695, %v661_v53 }
 0x12e   : > { %v785_v6 = vadd.f32 %v771_v2, %v761_v0  ;;  %v662_v16 = vsub.f32 %v1490_v23, %v653_v41  ;;  %v723_v58 = vld [vmem:[%s433_s22] sm:$0x3]  ;;  %v669_v8 = vmul.f32 1.442695, %v658_v11 }
 0x12f   : > { %v778_v9 = vadd.f32 %v777_v4, %v774_v3  ;;  %v812_v13 = vrot.slane %v723_v58, %v478_v61  ;;  %v816_v3 = vrot.slane %v723_v58, %v482_v1 }
 0x130   : > { %v786_v12 = vadd.f32 %v785_v6, %v773_v5  ;;  %v677_v62 = vmul.f32 1.442695, %v662_v16  ;;  %v849_v4 = vpop.permute.xlu1 %848 }
 0x131   : > { %v779_v14 = vrot.slane %v778_v9, 4 }
 0x132   : > { %v787_v15 = vadd.f32 %v786_v12, %v775_v10 }
 0x133   : > { %v780_v17 = vadd.f32 %v779_v14, %v778_v9 }
 0x134   : > { %v788_v20 = vrot.slane %v787_v15, 4  ;;  %v695_v29 = vpop.permute.xlu1 %694 }
 0x135   : > { %v781_v21 = vrot.slane %v780_v17, 2 }
 0x136   : > { %v789_v22 = vadd.f32 %v788_v20, %v787_v15  ;;  %v844_v20 = vpop.permute.xlu0 %843 }
 0x137   : > { %v782_v24 = vadd.f32 %v781_v21, %v780_v17 }
 0x138   : > { %v790_v25 = vrot.slane %v789_v22, 2  ;;  %v705_v40 = vpop.permute.xlu1 %704 }
 0x139   : > { %v783_v26 = vrot.slane %v782_v24, 1 }
 0x13a   : > { %v791_v27 = vadd.f32 %v790_v25, %v789_v22  ;;  %v690_v38 = vpop.permute.xlu0 %689 }
 0x13b   : > { %v784_v28 = vadd.f32 %v783_v26, %v782_v24 }
 0x13c   : > { %v792_v30 = vrot.slane %v791_v27, 1  ;;  %v891_v48 = vpop.permute.xlu1 %890 }
 0x13d   : > { %v794_v32 = vmul.f32 0.125, %v784_v28 }
 0x13e   : > { %v793_v33 = vadd.f32 %v792_v30, %v791_v27 }
 0x13f   : > { %v796_v34 = vadd.f32 0.001, %v794_v32 }
 0x140   : > { %v795_v35 = vmul.f32 0.125, %v793_v33 }
 0x141   : > { %1214 = vrsqrt.f32 %v796_v34 }
 0x142   : > { %v797_v39 = vadd.f32 0.001, %v795_v35 }
 0x144   : > { %1216 = vrsqrt.f32 %v797_v39 }
 0x145   : > { %1218 = vpow2.f32 %v671_v47  ;;  %v700_v47 = vpop.permute.xlu0 %699 }
 0x146   : > { %1220 = vpow2.f32 %v663_v49 }
 0x147   : > { %1222 = vpow2.f32 %v665_v55 }
 0x148   : > { %1224 = vpow2.f32 %v673_v7 }
 0x149   : > { %1226 = vpow2.f32 %v667_v19  ;;  %v886_v7 = vpop.permute.xlu0 %885 }
 0x14a   : > { %1228 = vpow2.f32 %v675_v56 }
 0x14b   : > { %1230 = vpow2.f32 %v669_v8 }
 0x14c   : > { %1232 = vpow2.f32 %v677_v62 }
 0x14e   : > { %v1215_v59 = vpop.eup %1214 }
 0x14f   : > { %v802_v18 = vmul.f32 %v1215_v59, %v1496_v43  ;;  %v800_v0 = vmul.f32 %v1215_v59, %v1502_v45  ;;  %v806_v2 = vmul.f32 %v1215_v59, %v1499_v44  ;;  %v804_v23 = vmul.f32 %v1215_v59, %v1505_v46 }
 0x151   : > { %v1217_v5 = vpop.eup %1216  ;;  %v821_v6 = vadd.f32 %v812_v13, %v802_v18  ;;  %v819_v61 = vadd.f32 %v812_v13, %v800_v0  ;;  %v825_v9 = vadd.f32 %v812_v13, %v806_v2  ;;  %v823_v10 = vadd.f32 %v812_v13, %v804_v23  ;;  %v901_v13 = vpop.permute.xlu1 %900 }
 0x152   : > { %v803_v12 = vmul.f32 %v1217_v5, %v1518_v52  ;;  %v801_v43 = vmul.f32 %v1217_v5, %v1515_v51  ;;  %v807_v45 = vmul.f32 %v1217_v5, %v1512_v50  ;;  %v805_v44 = vmul.f32 %v1217_v5, %v1523_v54  ;;  %v1219_v52 = vpop.eup %1218 }
 0x153   : > { %v853_v46 = vsub.f32 %v821_v6, %v839_v57  ;;  %v851_v14 = vsub.f32 %v819_v61, %v834_v63  ;;  %v857_v15 = vsub.f32 %v825_v9, %v849_v4  ;;  %v855_v26 = vsub.f32 %v823_v10, %v844_v20  ;;  %v1221_v54 = vpop.eup %1220 }
 0x154   : > { %v822_v60 = vadd.f32 %v816_v3, %v803_v12  ;;  %v820_v1 = vadd.f32 %v816_v3, %v801_v43  ;;  %v826_v17 = vadd.f32 %v816_v3, %v807_v45  ;;  %v824_v21 = vadd.f32 %v816_v3, %v805_v44  ;;  %v1223_v30 = vpop.eup %1222 }
 0x155   : > { %v863_v22 = vmul.f32 1.442695, %v853_v46  ;;  %v859_v24 = vmul.f32 1.442695, %v851_v14  ;;  %v871_v25 = vmul.f32 1.442695, %v857_v15  ;;  %v1225_v34 = vpop.eup %1224  ;;  %v711_v49 = vmul.f32 %v1219_v52, %v700_v47  ;;  %v896_v15 = vpop.permute.xlu0 %895 }
 0x156   : > { %v854_v27 = vsub.f32 %v822_v60, %v839_v57  ;;  %v852_v51 = vsub.f32 %v820_v1, %v834_v63  ;;  %v858_v28 = vsub.f32 %v826_v17, %v849_v4  ;;  %v856_v50 = vsub.f32 %v824_v21, %v844_v20  ;;  %v1227_v36 = vpop.eup %1226 }
 0x157   : > { %1234 = vpow2.f32 %v863_v22  ;;  %v867_v35 = vmul.f32 1.442695, %v855_v26  ;;  %v1229_v39 = vpop.eup %1228  ;;  %v707_v55 = vmul.f32 %v1221_v54, %v690_v38  ;;  %v709_v19 = vmul.f32 %v1227_v36, %v695_v29 }
 0x158   : > { %v865_v31 = vmul.f32 1.442695, %v854_v27  ;;  %1236 = vpow2.f32 %v859_v24  ;;  %v861_v32 = vmul.f32 1.442695, %v852_v51  ;;  %v873_v33 = vmul.f32 1.442695, %v858_v28  ;;  %v1231_v41 = vpop.eup %1230 }
 0x159   : > { %1238 = vpow2.f32 %v871_v25  ;;  %v869_v37 = vmul.f32 1.442695, %v856_v50  ;;  %v1233_v42 = vpop.eup %1232  ;;  %v708_v56 = vmul.f32 %v1223_v30, %v690_v38  ;;  %v710_v58 = vmul.f32 %v1231_v41, %v695_v29 }
 0x15a   : > { %1240 = vpow2.f32 %v865_v31  ;;  %v713_v62 = vmul.f32 %v1229_v39, %v705_v40  ;;  %v714_v63 = vmul.f32 %v1233_v42, %v705_v40  ;;  %v719_v18 = vmul.f32 0.25, %v711_v49 }
 0x15b   : > { %1242 = vpow2.f32 %v861_v32  ;;  %v715_v23 = vmul.f32 0.25, %v707_v55  ;;  %v712_v3 = vmul.f32 %v1225_v34, %v700_v47  ;;  %v717_v61 = vmul.f32 0.25, %v709_v19 }
 0x15c   : > { %1244 = vpow2.f32 %v873_v33  ;;  %v716_v9 = vmul.f32 0.25, %v708_v56  ;;  %v718_v45 = vmul.f32 0.25, %v710_v58  ;;  %v721_v1 = vmul.f32 0.25, %v713_v62 }
 0x15d   : > { %1246 = vpow2.f32 %v867_v35  ;;  %v722_v17 = vmul.f32 0.25, %v714_v63  ;;  %v720_v52 = vmul.f32 0.25, %v712_v3 }
 0x15e   : > { %1248 = vpow2.f32 %v869_v37 }
 0x164   : > { %v1235_v53 = vpop.eup %1234 }
 0x165   : > { %v1237_v11 = vpop.eup %1236  ;;  %v905_v16 = vmul.f32 %v1235_v53, %v891_v48 }
 0x166   : > { %v1239_v57 = vpop.eup %1238  ;;  %v903_v8 = vmul.f32 %v1237_v11, %v886_v7 }
 0x167   : > { %v1241_v59 = vpop.eup %1240  ;;  %v909_v0 = vmul.f32 %v1239_v57, %v901_v13  ;;  %v913_v5 = vmul.f32 0.75, %v905_v16 }
 0x168   : > { %v1243_v2 = vpop.eup %1242  ;;  %v906_v4 = vmul.f32 %v1241_v59, %v891_v48  ;;  %v911_v12 = vmul.f32 0.75, %v903_v8 }
 0x169   : > { %v1245_v6 = vpop.eup %1244  ;;  %v904_v10 = vmul.f32 %v1243_v2, %v886_v7  ;;  %v917_v14 = vmul.f32 0.75, %v909_v0  ;;  %v921_v22 = vadd.f32 %v913_v5, %v717_v61 }
 0x16a   : > { %v1247_v43 = vpop.eup %1246  ;;  %v914_v44 = vmul.f32 0.75, %v906_v4  ;;  %v910_v46 = vmul.f32 %v1245_v6, %v901_v13  ;;  %v919_v27 = vadd.f32 %v911_v12, %v715_v23 }
 0x16b   : > { %v1249_v60 = vpop.eup %1248  ;;  %v912_v20 = vmul.f32 0.75, %v904_v10  ;;  %v907_v21 = vmul.f32 %v1247_v43, %v896_v15  ;;  %v925_v29 = vadd.f32 %v917_v14, %v721_v1 }
 0x16c   : > { %v922_v24 = vadd.f32 %v914_v44, %v718_v45  ;;  %v918_v25 = vmul.f32 0.75, %v910_v46  ;;  %v908_v26 = vmul.f32 %v1249_v60, %v896_v15 }
 0x16d   : > { %v920_v51 = vadd.f32 %v912_v20, %v716_v9  ;;  %v915_v28 = vmul.f32 0.75, %v907_v21 }
 0x16e   : > { %v1125_v50 = vpack.c.bf16 %v922_v24, %v921_v22  ;;  %v926_v54 = vadd.f32 %v918_v25, %v722_v17  ;;  %v916_v30 = vmul.f32 0.75, %v908_v26 }
 0x16f   : > { %v1124_v31 = vpack.c.bf16 %v920_v51, %v919_v27  ;;  %v923_v33 = vadd.f32 %v915_v28, %v719_v18 }
 0x170   : > { %952 = vst [vmem:[%s423_s27 + $0x8] sm:$0xff] %v1125_v50  ;;  %v1127_v32 = vpack.c.bf16 %v926_v54, %v925_v29  ;;  %v924_v34 = vadd.f32 %v916_v30, %v720_v52  ;;  %961 = sbr.rel (!%p1351_p5) target bundleno = 381 (0x17d), region = 94 }
 0x171   : > { %951 = vst [vmem:[%s423_s27] sm:$0xff] %v1124_v31 }
 0x172   : > { %954 = vst [vmem:[%s423_s27 + $0x18] sm:$0xff] %v1127_v32  ;;  %v1126_v35 = vpack.c.bf16 %v924_v34, %v923_v33 }
 0x174   : > { %953 = vst [vmem:[%s423_s27 + $0x10] sm:$0xff] %v1126_v35 }
 0x177   : > { %v1001_v37 = vld [vmem:[%s423_s27 + $0x8] sm:$0xff] }
 0x178   : > { %v999_v36 = vld [vmem:[%s423_s27] sm:$0xff]  ;;  %1002 = vst [vmem:[%s964_s26 + $0x18] sm:$0xff] %v1001_v37 }
 0x179   : > { %v1005_v39 = vld [vmem:[%s423_s27 + $0x18] sm:$0xff]  ;;  %1000 = vst [vmem:[%s964_s26] sm:$0xff] %v999_v36 }
 0x17a   : > { %1006 = vst [vmem:[%s964_s26 + $0x48] sm:$0xff] %v1005_v39 }
 0x17b   : > { %v1003_v38 = vld [vmem:[%s423_s27 + $0x10] sm:$0xff] }
 0x17c   : > { %1004 = vst [vmem:[%s964_s26 + $0x30] sm:$0xff] %v1003_v38 }
 0x17d PF: > { %p15_p11 = scmp.ge.s32.totalorder %s1339_s9, 5   ;;  %s1587_s27 = smov %s1268_s28 }
 0x17e   : > { %s1588_s28 = smov %s1349_s12  ;;  %s1589_s29 = smov %s1339_s9 }
 0x17f   :  { %17 = sbr.rel (!%p15_p11) target bundleno = 2 (0x2), region = 169 }

// kernel: vae_forward.2
= control target key start
LH: loop header
LB: loop body
LE: loop exit
PB: predicated region body
PF: predicated region fallthrough
CT: control target
= control target key end

     0   :  { %s2774_s0 = inlined_call_operand.vmem [shape: s8[32,768], index: 0, kind: input, shape index: {}]   ;;  %s2775_s1 = inlined_call_operand.vmem [shape: bf16[768,128], index: 1, kind: input, shape index: {}]   ;;  %s2776_s2 = inlined_call_operand.vmem [shape: bf16[128,768], index: 2, kind: input, shape index: {}]   ;;  %s2777_s3 = inlined_call_operand.vmem [shape: f32[1,768], index: 3, kind: input, shape index: {}]   ;;  %s2778_s4 = inlined_call_operand.vmem [shape: f32[1,768], index: 4, kind: input, shape index: {}]   ;;  %s2779_s5 = inlined_call_operand.vmem [shape: bf16[32,128], index: 5, kind: input, shape index: {}]   ;;  %s2780_s6 = inlined_call_operand.vmem [shape: f32[1,128], index: 6, kind: input, shape index: {}]   ;;  %s2781_s7 = inlined_call_operand.vmem [shape: bf16[128,128], index: 7, kind: input, shape index: {}]   ;;  %s2782_s8 = inlined_call_operand.vmem [shape: f32[1,128], index: 8, kind: input, shape index: {}]   ;;  %s2783_s9 = inlined_call_operand.vmem [shape: f32[1,128], index: 9, kind: input, shape index: {}]   ;;  %s2784_s10 = inlined_call_operand.vmem [shape: f32[32,128], index: 10, kind: output, shape index: {0}]   ;;  %s2785_s11 = inlined_call_operand.vmem [shape: f32[32,1], index: 11, kind: output, shape index: {1}]   ;;  %s2786_s12 = inlined_call_operand.vmem [shape: f32[32,1], index: 12, kind: output, shape index: {2}]   ;;  %s2787_s13 = inlined_call_operand.vmem [shape: f32[32,1], index: 13, kind: output, shape index: {3}]   ;;  %s2788_s14 = inlined_call_operand.vmem [shape: f32[32,1], index: 14, kind: output, shape index: {4}]  }
   0x1   :  { %2793 = sst [smem:[#allocation7_spill]] %s2776_s2 }
   0x2   :  { %2794 = sst [smem:[#allocation8_spill]] %s2783_s9 }
   0x3   :  { %2795 = sst [smem:[#allocation9_spill]] %s2784_s10 }
   0x4   :  { %s2193_s29 = smov 0   ;;  %s2195_s30 = smov 0  }
   0x5   :  { %s2197_s15 = smov 0  }
   0x6 LB: > { %2796 = sst [smem:[#allocation4_spill]] %s2109_s30  ;;  %s2209_s16 = sadd.s32 4294967295, %s2113_s15   ;;  %s2113_s15 = sphi %s2197_s15, %s2802_s15   ;;  %s2109_s30 = sphi %s2195_s30, %s2804_s30   ;;  %s2105_s29 = sphi %s2193_s29, %s2803_s29  }
   0x7   : > { %s2212_s17 = sadd.s32 1, %s2113_s15   ;;  %s84_s19 = sadd.s32 1, %s2109_s30 }
   0x8   : > { %2797 = sst [smem:[#allocation5_spill]] %s2212_s17  ;;  %s81_s18 = ssub.s32 %s2113_s15, %s2212_s17 }
   0x9   : > { %p82_p0 = scmp.eq.s32.totalorder %s81_s18, 0  ;;  %p91_p1 = scmp.ne.s32.totalorder %s2109_s30, %s2105_s29 }
   0xa   : > { %p92_p2 = scmp.eq.s32.totalorder %s2113_s15, 0  ;;  %p1739_p4 = scmp.ge.s32.totalorder %s2113_s15, 3 }
   0xb   : > { %s2221_s20 = scalar_select %p82_p0, %s2109_s30, %s84_s19  }
   0xc   : > { %p93_p3 = por %p92_p2, %p91_p1  ;;  %394 = sbr.rel (%p1739_p4) target bundleno = 35 (0x23), region = 36 }
   0xd   : > { %2798 = sst [smem:[#allocation6_spill]] %s2221_s20 }
  0x11   : > { %415 = sbr.rel (!%p93_p3) target bundleno = 35 (0x23), region = 48  ;;  %s417_s21 = sand.u32 (%p93_p3), 1, %s2109_s30  }
  0x12   : > { %s1792_s22 = sshll.u32 (%p93_p3), %s2113_s15, 3  ;;  %s1740_s23 = sshll.u32 (%p93_p3), %s417_s21, 7 }
  0x13   : > { %s2799_s2 = sld [smem:[#allocation7_spill]] (%p93_p3)  ;;  %s419_s27 = scalar_lea.vmem (%p93_p3), [#allocation3], %s1740_s23 }
  0x19   : > { %s2229_s26 = scalar_lea.vmem %s2799_s2, %s1792_s22 }
  0x1a   : > { %v481_v0 = vld [vmem:[%s2229_s26] sm:$0xff]  ;;  %v483_v1 = vld [vmem:[%s2229_s26 + $0x18] sm:$0xff]  ;;  %v485_v2 = vld [vmem:[%s2229_s26 + $0x30] sm:$0xff] }
  0x1b   : > { %482 = vst [vmem:[%s419_s27] sm:$0xff] %v481_v0  ;;  %484 = vst [vmem:[%s419_s27 + $0x8] sm:$0xff] %v483_v1  ;;  %v487_v3 = vld [vmem:[%s2229_s26 + $0x48] sm:$0xff]  ;;  %v489_v4 = vld [vmem:[%s2229_s26 + $0x60] sm:$0xff] }
  0x1c   : > { %486 = vst [vmem:[%s419_s27 + $0x10] sm:$0xff] %v485_v2  ;;  %v491_v5 = vld [vmem:[%s2229_s26 + $0x78] sm:$0xff]  ;;  %488 = vst [vmem:[%s419_s27 + $0x18] sm:$0xff] %v487_v3  ;;  %v493_v6 = vld [vmem:[%s2229_s26 + $0x90] sm:$0xff] }
  0x1d   : > { %490 = vst [vmem:[%s419_s27 + $0x20] sm:$0xff] %v489_v4  ;;  %492 = vst [vmem:[%s419_s27 + $0x28] sm:$0xff] %v491_v5  ;;  %v495_v7 = vld [vmem:[%s2229_s26 + $0xa8] sm:$0xff]  ;;  %v497_v8 = vld [vmem:[%s2229_s26 + $0xc0] sm:$0xff] }
  0x1e   : > { %494 = vst [vmem:[%s419_s27 + $0x30] sm:$0xff] %v493_v6  ;;  %496 = vst [vmem:[%s419_s27 + $0x38] sm:$0xff] %v495_v7  ;;  %v499_v9 = vld [vmem:[%s2229_s26 + $0xd8] sm:$0xff]  ;;  %v501_v10 = vld [vmem:[%s2229_s26 + $0xf0] sm:$0xff] }
  0x1f   : > { %498 = vst [vmem:[%s419_s27 + $0x40] sm:$0xff] %v497_v8  ;;  %v503_v11 = vld [vmem:[%s2229_s26 + $0x108] sm:$0xff]  ;;  %500 = vst [vmem:[%s419_s27 + $0x48] sm:$0xff] %v499_v9  ;;  %v505_v12 = vld [vmem:[%s2229_s26 + $0x120] sm:$0xff] }
  0x20   : > { %502 = vst [vmem:[%s419_s27 + $0x50] sm:$0xff] %v501_v10  ;;  %504 = vst [vmem:[%s419_s27 + $0x58] sm:$0xff] %v503_v11  ;;  %v507_v13 = vld [vmem:[%s2229_s26 + $0x138] sm:$0xff]  ;;  %v509_v14 = vld [vmem:[%s2229_s26 + $0x150] sm:$0xff] }
  0x21   : > { %506 = vst [vmem:[%s419_s27 + $0x60] sm:$0xff] %v505_v12  ;;  %508 = vst [vmem:[%s419_s27 + $0x68] sm:$0xff] %v507_v13  ;;  %v511_v15 = vld [vmem:[%s2229_s26 + $0x168] sm:$0xff] }
  0x22   : > { %510 = vst [vmem:[%s419_s27 + $0x70] sm:$0xff] %v509_v14  ;;  %512 = vst [vmem:[%s419_s27 + $0x78] sm:$0xff] %v511_v15 }
  0x23 PF: > { %p1743_p5 = scmp.ge.s32.totalorder %s2113_s15, 1  ;;  %p533_p6 = scmp.lt.s32.totalorder %s2113_s15, 4 }
  0x25   : > { %p534_p7 = pnand %p1743_p5, %p533_p6 }
  0x26   : > { %s540_s28 = sand.u32 (!%p534_p7), 1, %s2105_s29   ;;  %s1745_s18 = sshll.u32 (!%p534_p7), %s2209_s16, 1 }
  0x27   : > { %537 = sbr.rel (%p534_p7) target bundleno = 1157 (0x485), region = 94  ;;  %s1744_s19 = sshll.u32 (!%p534_p7), %s540_s28, 7 }
  0x28   : > { %p599_p8 = scmp.lt.s32.totalorder (!%p534_p7), %s1745_s18, 5  ;;  %s1747_s21 = sshll.u32 (!%p534_p7), %s2209_s16, 5 }
  0x29   : > { %p605_p9 = scmp.lt.s32.totalorder (!%p534_p7), %s1747_s21, 95  ;;  %s2273_s9 = scalar_lea.vmem (!%p534_p7), [#allocation3], %s1744_s19 }
  0x2a   : > { %p1751_p10 = scmp.ne.s32.totalorder (!%p534_p7), %s2209_s16, 0 }
  0x2c   : > { %s2806_s18 = smov (!%p599_p8, %s1745_s18), 5  ;;  %s2808_s21 = smov (!%p605_p9, %s1747_s21), 95 }
  0x2d   : > { %s1746_s22 = sshll.u32 %s2806_s18, 3  ;;  %s614_s15 = scalar_lea.vmem %s2777_s3, %s2806_s18 }
  0x2e   : > { %s2262_s27 = scalar_lea.vmem %s2774_s0, %s1746_s22  ;;  %s619_s2 = scalar_lea.vmem %s2778_s4, %s2806_s18 }
  0x2f   : > { %s1748_s20 = sshll.u32 %s2808_s21, 2  ;;  %642 = sbr.rel (%p1751_p10) target bundleno = 63 (0x3f), region = 102 }
  0x30   : > { %s2271_s10 = scalar_lea.vmem %s2775_s1, %s1748_s20 }
  0x34   : > { %vm647_vm0 = vcmask 7168   ;;  %v2115_v16 = vmov 0.0   ;;  %v2116_v17 = vmov -inf  }
  0x35   : > { %643 = vst [vmem:[#allocation2 + $0x10] sm:$0xff] %v2115_v16  ;;  %644 = vst [vmem:[#allocation2] sm:$0xff] %v2115_v16 }
  0x36   : > { %645 = vst [vmem:[#allocation2 + $0x18] sm:$0xff] %v2115_v16  ;;  %646 = vst [vmem:[#allocation2 + $0x8] sm:$0xff] %v2115_v16 }
  0x37   : > { %648 = vst.msk [vmem:[%s2785_s11] sm:$0xff] %vm647_vm0, %v2116_v17  ;;  %649 = vst.msk [vmem:[%s2785_s11 + $0x8] sm:$0xff] %vm647_vm0, %v2116_v17 }
  0x38   : > { %650 = vst.msk [vmem:[%s2785_s11 + $0x10] sm:$0xff] %vm647_vm0, %v2116_v17  ;;  %651 = vst.msk [vmem:[%s2785_s11 + $0x18] sm:$0xff] %vm647_vm0, %v2116_v17 }
  0x39   : > { %652 = vst.msk [vmem:[%s2786_s12] sm:$0xff] %vm647_vm0, %v2115_v16  ;;  %653 = vst.msk [vmem:[%s2786_s12 + $0x8] sm:$0xff] %vm647_vm0, %v2115_v16 }
  0x3a   : > { %654 = vst.msk [vmem:[%s2786_s12 + $0x10] sm:$0xff] %vm647_vm0, %v2115_v16  ;;  %655 = vst.msk [vmem:[%s2786_s12 + $0x18] sm:$0xff] %vm647_vm0, %v2115_v16 }
  0x3b   : > { %656 = vst.msk [vmem:[%s2787_s13] sm:$0xff] %vm647_vm0, %v2116_v17  ;;  %657 = vst.msk [vmem:[%s2787_s13 + $0x8] sm:$0xff] %vm647_vm0, %v2116_v17 }
  0x3c   : > { %658 = vst.msk [vmem:[%s2787_s13 + $0x10] sm:$0xff] %vm647_vm0, %v2116_v17  ;;  %659 = vst.msk [vmem:[%s2787_s13 + $0x18] sm:$0xff] %vm647_vm0, %v2116_v17 }
  0x3d   : > { %660 = vst.msk [vmem:[%s2788_s14] sm:$0xff] %vm647_vm0, %v2115_v16  ;;  %661 = vst.msk [vmem:[%s2788_s14 + $0x8] sm:$0xff] %vm647_vm0, %v2115_v16 }
  0x3e   : > { %662 = vst.msk [vmem:[%s2788_s14 + $0x10] sm:$0xff] %vm647_vm0, %v2115_v16  ;;  %663 = vst.msk [vmem:[%s2788_s14 + $0x18] sm:$0xff] %vm647_vm0, %v2115_v16 }
  0x3f PF: > { %v1979_v18 = vld [vmem:[%s2273_s9 + $0x74] ss:$8 sps:$4 sm:$0xff]   ;;  %v1981_v19 = vld [vmem:[%s2273_s9 + $0x70] ss:$8 sps:$4 sm:$0xff]   ;;  %v2117_v20 = vmov 0   ;;  %v2003_v35 = vld [vmem:[%s2779_s5] sm:$0xff]   ;;  %v881_v37 = vlaneseq }
  0x40   : > { %1015 = vmatprep.mubr.bf16.mxu1 %v2117_v20  ;;  %1977 = vset.pattern.permute.xlu0 %v2117_v20  ;;  %v1982_v21 = vld [vmem:[%s2273_s9 + $0x64] ss:$8 sps:$4 sm:$0xff]   ;;  %v1984_v22 = vld [vmem:[%s2273_s9 + $0x60] ss:$8 sps:$4 sm:$0xff]   ;;  %v1985_v23 = vld [vmem:[%s2273_s9 + $0x54] ss:$8 sps:$4 sm:$0xff]  }
  0x41   : > { %983 = vmatprep.subr.bf16.mxu1 %v1979_v18  ;;  %1978 = vset.pattern.permute.xlu1 %v2117_v20  ;;  %v1987_v24 = vld [vmem:[%s2273_s9 + $0x50] ss:$8 sps:$4 sm:$0xff]   ;;  %v1988_v25 = vld [vmem:[%s2273_s9 + $0x44] ss:$8 sps:$4 sm:$0xff]   ;;  %v1990_v26 = vld [vmem:[%s2273_s9 + $0x40] ss:$8 sps:$4 sm:$0xff]  }
  0x42   : > { %984 = vmatpush1.bf16.msra.mxu1 %v1981_v19  ;;  %v1991_v27 = vld [vmem:[%s2273_s9 + $0x34] ss:$8 sps:$4 sm:$0xff]   ;;  %v1993_v28 = vld [vmem:[%s2273_s9 + $0x30] ss:$8 sps:$4 sm:$0xff]   ;;  %v1994_v29 = vld [vmem:[%s2273_s9 + $0x24] ss:$8 sps:$4 sm:$0xff]  }
  0x43   : > { %985 = vmatprep.subr.bf16.mxu1 %v1982_v21  ;;  %v1996_v30 = vld [vmem:[%s2273_s9 + $0x20] ss:$8 sps:$4 sm:$0xff]   ;;  %v1997_v31 = vld [vmem:[%s2273_s9 + $0x14] ss:$8 sps:$4 sm:$0xff]   ;;  %v1999_v32 = vld [vmem:[%s2273_s9 + $0x10] ss:$8 sps:$4 sm:$0xff]  }
  0x44   : > { %v2000_v33 = vld [vmem:[%s2273_s9 + $0x4] ss:$8 sps:$4 sm:$0xff]   ;;  %v2002_v34 = vld [vmem:[%s2273_s9] ss:$8 sps:$4 sm:$0xff]   ;;  %v2362_v38 = vshrl.u32 %v881_v37, 7  ;;  %vm1136_vm1 = vcmask 7168  }
  0x45   : > { %v2004_v36 = vld [vmem:[%s2779_s5 + $0x8] sm:$0xff]   ;;  %v879_v41 = vld [vmem:[%s614_s15] sm:$0x3]  ;;  %p1786_p11 = scmp.ne.s32.totalorder %s2209_s16, 2 }
  0x46   : > { %986 = vmatpush1.bf16.msra.mxu1 %v1984_v22  ;;  %v883_v39 = vsub.s32 0, %v2362_v38  ;;  %v887_v40 = vsub.s32 1, %v2362_v38  ;;  %s2800_s22 = sld [smem:[#allocation8_spill]] (!%p1786_p11) }
  0x47   : > { %987 = vmatprep.subr.bf16.mxu1 %v1985_v23  ;;  %s2801_s16 = sld [smem:[#allocation9_spill]] (!%p1786_p11) }
  0x48   : > { %v884_v42 = vrot.slane %v879_v41, %v883_v39  ;;  %v888_v43 = vrot.slane %v879_v41, %v887_v40 }
  0x4a   : > { %988 = vmatpush1.bf16.msra.mxu1 %v1987_v24 }
  0x4b   : > { %989 = vmatprep.subr.bf16.mxu1 %v1988_v25 }
  0x4e   : > { %990 = vmatpush1.bf16.msra.mxu1 %v1990_v26 }
  0x4f   : > { %991 = vmatprep.subr.bf16.mxu1 %v1991_v27 }
  0x52   : > { %992 = vmatpush1.bf16.msra.mxu1 %v1993_v28 }
  0x53   : > { %993 = vmatprep.subr.bf16.mxu1 %v1994_v29 }
  0x56   : > { %994 = vmatpush1.bf16.msra.mxu1 %v1996_v30 }
  0x57   : > { %995 = vmatprep.subr.bf16.mxu1 %v1997_v31 }
  0x5a   : > { %996 = vmatpush1.bf16.msra.mxu1 %v1999_v32 }
  0x5b   : > { %997 = vmatprep.subr.bf16.mxu1 %v2000_v33 }
  0x5e   : > { %998 = vmatpush1.bf16.msra.mxu1 %v2002_v34 }
  0x61   : > { %1016 = vmatmul.mubr.bf16.vlgmr.msra.gmra.mxu1 %v2003_v35 }
  0x62   : > { %1025 = vmatprep.mubr.bf16.mxu1 %v2117_v20 }
  0x69   : > { %1026 = vmatmul.mubr.bf16.gmra.mxu1 %v2004_v36 }
 0x121   : > { %v1017_v44 = vpop.f32.mrf.mxu1 }
 0x122   : > { %v2375_v46 = vadd.f32 %v1017_v44, %v884_v42 }
 0x123   : > { %v1019_v45 = vpop.f32.mrf.mxu1 }
 0x124   : > { %v2377_v47 = vadd.f32 %v1019_v45, %v888_v43 }
 0x125   : > { %v1021_v48 = vpop.f32.mrf.mxu1 }
 0x126   : > { %v2379_v49 = vadd.f32 %v1021_v48, %v884_v42  ;;  %v1040_v50 = vmax.f32 %v2375_v46, %v2377_v47 }
 0x127   : > { %v1023_v51 = vpop.f32.mrf.mxu1 }
 0x128   : > { %v2383_v52 = vadd.f32 %v1023_v51, %v888_v43  ;;  %1041 = vmax.xlane.f32.xlu0 %v1040_v50  ;;  %v1148_v54 = vmul.f32 0.0, %v2379_v49 }
 0x129   : > { %v1027_v53 = vpop.f32.mrf.mxu1 }
 0x12a   : > { %v2386_v55 = vadd.f32 %v1027_v53, %v884_v42  ;;  %v1043_v56 = vmax.f32 %v2379_v49, %v2383_v52  ;;  %v1149_v58 = vmul.f32 0.0, %v2383_v52  ;;  %v1154_v62 = vadd.f32 %v1148_v54, %v2375_v46 }
 0x12b   : > { %v1029_v57 = vpop.f32.mrf.mxu1 }
 0x12c   : > { %v1150_v59 = vmul.f32 0.0, %v2386_v55  ;;  %v2392_v60 = vadd.f32 %v1029_v57, %v888_v43  ;;  %1044 = vmax.xlane.f32.xlu0 %v1043_v56  ;;  %v1163_v3 = vadd.f32 %v1149_v58, %v2377_v47 }
 0x12d   : > { %v1031_v61 = vpop.f32.mrf.mxu1 }
 0x12e   : > { %v1151_v63 = vmul.f32 0.0, %v2392_v60  ;;  %v2396_v0 = vadd.f32 %v1031_v61, %v884_v42  ;;  %v1046_v1 = vmax.f32 %v2386_v55, %v2392_v60  ;;  %v1155_v4 = vadd.f32 %v1154_v62, %v1150_v59 }
 0x12f   : > { %v1033_v2 = vpop.f32.mrf.mxu1 }
 0x130   : > { %v1152_v5 = vmul.f32 0.0, %v2396_v0  ;;  %v2402_v6 = vadd.f32 %v1033_v2, %v888_v43  ;;  %1047 = vmax.xlane.f32.xlu1 %v1046_v1  ;;  %v1164_v7 = vadd.f32 %v1163_v3, %v1151_v63 }
 0x132   : > { %v1156_v8 = vadd.f32 %v1155_v4, %v1152_v5  ;;  %v1153_v9 = vmul.f32 0.0, %v2402_v6  ;;  %v1049_v10 = vmax.f32 %v2396_v0, %v2402_v6 }
 0x134   : > { %v1157_v11 = vrot.slane %v1156_v8, 4  ;;  %v1165_v12 = vadd.f32 %v1164_v7, %v1153_v9  ;;  %1050 = vmax.xlane.f32.xlu1 %v1049_v10 }
 0x136   : > { %v1158_v13 = vadd.f32 %v1157_v11, %v1156_v8  ;;  %v1166_v14 = vrot.slane %v1165_v12, 4 }
 0x138   : > { %v1159_v15 = vrot.slane %v1158_v13, 2  ;;  %v1167_v16 = vadd.f32 %v1166_v14, %v1165_v12 }
 0x13a   : > { %v1160_v17 = vadd.f32 %v1159_v15, %v1158_v13  ;;  %v1168_v18 = vrot.slane %v1167_v16, 2 }
 0x13c   : > { %v1161_v19 = vrot.slane %v1160_v17, 1  ;;  %v1169_v20 = vadd.f32 %v1168_v18, %v1167_v16 }
 0x13e   : > { %v1162_v21 = vadd.f32 %v1161_v19, %v1160_v17  ;;  %v1170_v22 = vrot.slane %v1169_v20, 1  ;;  %v1145_v17 = vld [vmem:[%s619_s2] sm:$0x3] }
 0x13f   : > { %v1234_v19 = vrot.slane %v1145_v17, %v883_v39 }
 0x140   : > { %v1172_v23 = vmul.f32 0.125, %v1162_v21  ;;  %v1171_v24 = vadd.f32 %v1170_v22, %v1169_v20  ;;  %v1238_v20 = vrot.slane %v1145_v17, %v887_v40  ;;  %v2020_v17 = vld [vmem:[%s2271_s10] sm:$0xff]  }
 0x142   : > { %v1173_v25 = vmul.f32 0.125, %v1171_v24  ;;  %v1176_v26 = vsub.f32 %v2379_v49, %v1172_v23  ;;  %v1180_v27 = vsub.f32 %v2396_v0, %v1172_v23  ;;  %v1174_v28 = vsub.f32 %v2375_v46, %v1172_v23 }
 0x143   : > { %v1178_v29 = vsub.f32 %v2386_v55, %v1172_v23 }
 0x144   : > { %v1181_v30 = vsub.f32 %v2402_v6, %v1173_v25  ;;  %v1175_v31 = vsub.f32 %v2377_v47, %v1173_v25  ;;  %v1177_v32 = vsub.f32 %v2383_v52, %v1173_v25  ;;  %v1179_v33 = vsub.f32 %v2392_v60, %v1173_v25 }
 0x145   : > { %v1184_v34 = vmul.f32 %v1176_v26, %v1176_v26  ;;  %v1186_v35 = vmul.f32 %v1178_v29, %v1178_v29  ;;  %v1188_v37 = vmul.f32 %v1180_v27, %v1180_v27  ;;  %v1182_v41 = vmul.f32 %v1174_v28, %v1174_v28 }
 0x146   : > { %v1185_v36 = vmul.f32 %v1177_v32, %v1177_v32  ;;  %v1187_v42 = vmul.f32 %v1179_v33, %v1179_v33  ;;  %v1189_v44 = vmul.f32 %v1181_v30, %v1181_v30  ;;  %v1183_v45 = vmul.f32 %v1175_v31, %v1175_v31 }
 0x147   : > { %v1192_v43 = vmul.f32 0.0, %v1184_v34  ;;  %v1194_v50 = vmul.f32 0.0, %v1186_v35  ;;  %v1196_v56 = vmul.f32 0.0, %v1188_v37 }
 0x148   : > { %v1193_v48 = vmul.f32 0.0, %v1185_v36  ;;  %v1195_v53 = vmul.f32 0.0, %v1187_v42  ;;  %v1197_v58 = vmul.f32 0.0, %v1189_v44  ;;  %v2006_v44 = vld [vmem:[%s2271_s10 + $0x38] sm:$0xff]  }
 0x149   : > { %v1198_v51 = vadd.f32 %v1192_v43, %v1182_v41 }
 0x14a   : > { %v1207_v54 = vadd.f32 %v1193_v48, %v1183_v45 }
 0x14b   : > { %v1199_v57 = vadd.f32 %v1198_v51, %v1194_v50  ;;  %v2007_v50 = vld [vmem:[%s2271_s10 + $0x70] sm:$0xff]   ;;  %v2462_v51 = vld [vmem:[%s2785_s11 + $0x8] sm:$0xff] }
 0x14c   : > { %v1208_v59 = vadd.f32 %v1207_v54, %v1195_v53  ;;  %v2008_v53 = vld [vmem:[%s2271_s10 + $0x30] sm:$0xff]  }
 0x14d   : > { %v1200_v61 = vadd.f32 %v1199_v57, %v1196_v56 }
 0x14e   : > { %v1209_v62 = vadd.f32 %v1208_v59, %v1197_v58  ;;  %v2009_v58 = vld [vmem:[%s2271_s10 + $0x68] sm:$0xff]   ;;  %v2480_v59 = vld [vmem:[%s2785_s11 + $0x10] sm:$0xff] }
 0x14f   : > { %v1201_v63 = vrot.slane %v1200_v61, 4 }
 0x150   : > { %v1210_v1 = vrot.slane %v1209_v62, 4 }
 0x151   : > { %v1202_v2 = vadd.f32 %v1201_v63, %v1200_v61  ;;  %v2010_v61 = vld [vmem:[%s2271_s10 + $0x28] sm:$0xff]  }
 0x152   : > { %v1211_v3 = vadd.f32 %v1210_v1, %v1209_v62 }
 0x153   : > { %v1203_v4 = vrot.slane %v1202_v2, 2 }
 0x154   : > { %v1212_v5 = vrot.slane %v1211_v3, 2 }
 0x155   : > { %v1204_v7 = vadd.f32 %v1203_v4, %v1202_v2  ;;  %v2011_v2 = vld [vmem:[%s2271_s10 + $0x60] sm:$0xff]  }
 0x156   : > { %v1213_v8 = vadd.f32 %v1212_v5, %v1211_v3  ;;  %v2498_v3 = vld [vmem:[%s2785_s11 + $0x18] sm:$0xff]  ;;  %v2012_v4 = vld [vmem:[%s2271_s10 + $0x20] sm:$0xff]  }
 0x157   : > { %v1205_v9 = vrot.slane %v1204_v7, 1 }
 0x158   : > { %v1214_v10 = vrot.slane %v1213_v8, 1 }
 0x159   : > { %v1206_v11 = vadd.f32 %v1205_v9, %v1204_v7  ;;  %v2013_v9 = vld [vmem:[%s2271_s10 + $0x58] sm:$0xff]  }
 0x15a   : > { %v1215_v12 = vadd.f32 %v1214_v10, %v1213_v8  ;;  %v2014_v10 = vld [vmem:[%s2271_s10 + $0x18] sm:$0xff]  }
 0x15b   : > { %v1216_v13 = vmul.f32 0.125, %v1206_v11 }
 0x15c   : > { %v1217_v14 = vmul.f32 0.125, %v1215_v12  ;;  %v2015_v12 = vld [vmem:[%s2271_s10 + $0x50] sm:$0xff]  }
 0x15d   : > { %v1218_v15 = vadd.f32 0.001, %v1216_v13  ;;  %v2016_v13 = vld [vmem:[%s2271_s10 + $0x10] sm:$0xff]  }
 0x15e   : > { %v1219_v16 = vadd.f32 0.001, %v1217_v14  ;;  %v2017_v14 = vld [vmem:[%s2271_s10 + $0x48] sm:$0xff]  }
 0x15f   : > { %2021 = vrsqrt.f32 %v1218_v15  ;;  %v2018_v15 = vld [vmem:[%s2271_s10 + $0x8] sm:$0xff]  }
 0x160   : > { %2023 = vrsqrt.f32 %v1219_v16  ;;  %v2019_v16 = vld [vmem:[%s2271_s10 + $0x40] sm:$0xff]  }
 0x16c   : > { %v2022_v18 = vpop.eup %2021 }
 0x16d   : > { %v2024_v21 = vpop.eup %2023  ;;  %v1224_v22 = vmul.f32 %v2022_v18, %v1176_v26  ;;  %v1222_v23 = vmul.f32 %v2022_v18, %v1174_v28  ;;  %v1228_v36 = vmul.f32 %v2022_v18, %v1180_v27  ;;  %v1226_v37 = vmul.f32 %v2022_v18, %v1178_v29  ;;  %v665_v18 = vld [vmem:[%s2262_s27 + $0x8] sm:$0xff] }
 0x16e   : > { %v1225_v24 = vmul.f32 %v2024_v21, %v1177_v32  ;;  %v1223_v25 = vmul.f32 %v2024_v21, %v1175_v31  ;;  %v1229_v34 = vmul.f32 %v2024_v21, %v1181_v30  ;;  %v1227_v35 = vmul.f32 %v2024_v21, %v1179_v33  ;;  %v2005_v32 = vld [vmem:[%s2271_s10 + $0x78] sm:$0xff]   ;;  %v2452_v33 = vld [vmem:[%s2785_s11] sm:$0xff] }
 0x16f   : > { %v2424_v41 = vadd.f32 %v1234_v19, %v1224_v22  ;;  %v2428_v43 = vadd.f32 %v1234_v19, %v1222_v23  ;;  %v2440_v28 = vadd.f32 %v1234_v19, %v1228_v36  ;;  %v2442_v29 = vadd.f32 %v1234_v19, %v1226_v37  ;;  %1832 = vmatprep.subr.bf16.mxu0 %v2005_v32  ;;  %v664_v21 = vld [vmem:[%s2262_s27] sm:$0xff] }
 0x170   : > { %v2426_v42 = vadd.f32 %v1238_v20, %v1225_v24  ;;  %v2430_v39 = vadd.f32 %v1238_v20, %v1223_v25  ;;  %v2436_v26 = vadd.f32 %v1238_v20, %v1229_v34  ;;  %v2438_v27 = vadd.f32 %v1238_v20, %v1227_v35  ;;  %1833 = vmatpush3.bf16.msra.mxu0 %v2006_v44  ;;  %v2533_v24 = vld [vmem:[%s2787_s13 + $0x8] sm:$0xff]  ;;  %v2538_v25 = vld [vmem:[%s2787_s13] sm:$0xff] }
 0x171   : > { %1834 = vmatprep.subr.bf16.mxu0 %v2007_v50  ;;  %v667_v19 = vunpack.c.l.s8.bf16 %v665_v18  ;;  %v669_v20 = vunpack.c.h.s8.bf16 %v665_v18  ;;  %v666_v22 = vunpack.c.l.s8.bf16 %v664_v21  ;;  %v668_v23 = vunpack.c.h.s8.bf16 %v664_v21 }
 0x172   : > { %v1256_v38 = vmax.f32 %v2424_v41, %v2426_v42  ;;  %v1253_v40 = vmax.f32 %v2428_v43, %v2430_v39  ;;  %v1262_v30 = vmax.f32 %v2440_v28, %v2436_v26  ;;  %v1259_v31 = vmax.f32 %v2442_v29, %v2438_v27 }
 0x173   : > { %834 = vmatprep.mubr.bf16.mxu0 %v667_v19 }
 0x174   : > { %1257 = vmax.xlane.f32.xlu1 %v1256_v38  ;;  %1254 = vmax.xlane.f32.xlu0 %v1253_v40  ;;  %v2549_v38 = vld [vmem:[%s2787_s13 + $0x18] sm:$0xff]  ;;  %v2554_v40 = vld [vmem:[%s2787_s13 + $0x10] sm:$0xff] }
 0x175   : > { %1835 = vmatpush3.bf16.msra.mxu0 %v2008_v53 }
 0x176   : > { %1836 = vmatprep.subr.bf16.mxu0 %v2009_v58 }
 0x178   : > { %1263 = vmax.xlane.f32.xlu1 %v1262_v30  ;;  %1260 = vmax.xlane.f32.xlu0 %v1259_v31 }
 0x179   : > { %1837 = vmatpush3.bf16.msra.mxu0 %v2010_v61 }
 0x17a   : > { %1838 = vmatprep.subr.bf16.mxu0 %v2011_v2 }
 0x17d   : > { %1839 = vmatpush3.bf16.msra.mxu0 %v2012_v4 }
 0x17e   : > { %1840 = vmatprep.subr.bf16.mxu0 %v2013_v9 }
 0x181   : > { %1841 = vmatpush3.bf16.msra.mxu0 %v2014_v10 }
 0x182   : > { %1842 = vmatprep.subr.bf16.mxu0 %v2015_v12 }
 0x185   : > { %1843 = vmatpush3.bf16.msra.mxu0 %v2016_v13 }
 0x186   : > { %1844 = vmatprep.subr.bf16.mxu0 %v2017_v14 }
 0x189   : > { %1845 = vmatpush3.bf16.msra.mxu0 %v2018_v15 }
 0x18a   : > { %1846 = vmatprep.subr.bf16.mxu0 %v2019_v16 }
 0x18d   : > { %1847 = vmatpush3.bf16.msra.mxu0 %v2020_v17 }
 0x190   : > { %835 = vmatmul.mubr.bf16.vlgmr.msra.gmra.mxu0 %v666_v22 }
 0x191   : > { %842 = vmatprep.mubr.bf16.mxu0 %v669_v20 }
 0x198   : > { %843 = vmatmul.mubr.bf16.gmra.mxu0 %v668_v23 }
 0x1b1   : > { %v1042_v45 = vpop.xlane.xlu0 %1041 }
 0x1b2   : > { %v2456_v48 = vmax.f32 %v2452_v33, %v1042_v45 }
 0x1b4   : > { %v1060_v54 = vsub.f32 %v2452_v33, %v2456_v48  ;;  %1141 = vst.msk [vmem:[%s2785_s11] sm:$0xff] %vm1136_vm1, %v2456_v48  ;;  %1078 = vperm.xlu0 %1977, %v2456_v48   ;;  %v1056_v33 = vld [vmem:[%s2786_s12] sm:$0xff] }
 0x1b5   : > { %v1045_v56 = vpop.xlane.xlu0 %1044 }
 0x1b6   : > { %v2474_v57 = vmax.f32 %v2462_v51, %v1045_v56 }
 0x1b8   : > { %v1061_v62 = vsub.f32 %v2462_v51, %v2474_v57  ;;  %1142 = vst.msk [vmem:[%s2785_s11 + $0x8] sm:$0xff] %vm1136_vm1, %v2474_v57  ;;  %1083 = vperm.xlu1 %1978, %v2474_v57   ;;  %v1057_v57 = vld [vmem:[%s2786_s12 + $0x8] sm:$0xff] }
 0x1b9   : > { %v1048_v63 = vpop.xlane.xlu1 %1047 }
 0x1ba   : > { %v2492_v1 = vmax.f32 %v2480_v59, %v1048_v63 }
 0x1bc   : > { %v1062_v5 = vsub.f32 %v2480_v59, %v2492_v1  ;;  %1143 = vst.msk [vmem:[%s2785_s11 + $0x10] sm:$0xff] %vm1136_vm1, %v2492_v1  ;;  %1088 = vperm.xlu1 %1978, %v2492_v1  }
 0x1bd   : > { %v1051_v7 = vpop.xlane.xlu1 %1050 }
 0x1be   : > { %v2510_v8 = vmax.f32 %v2498_v3, %v1051_v7 }
 0x1c0   : > { %v1063_v11 = vsub.f32 %v2498_v3, %v2510_v8  ;;  %1144 = vst.msk [vmem:[%s2785_s11 + $0x18] sm:$0xff] %vm1136_vm1, %v2510_v8  ;;  %1093 = vperm.xlu1 %1978, %v2510_v8  }
 0x1fd   : > { %v1258_v34 = vpop.xlane.xlu1 %1257  ;;  %v1255_v35 = vpop.xlane.xlu0 %1254 }
 0x1fe   : > { %v2541_v36 = vmax.f32 %v2533_v24, %v1258_v34  ;;  %v2544_v37 = vmax.f32 %v2538_v25, %v1255_v35 }
 0x200   : > { %v1274_v30 = vsub.f32 %v2533_v24, %v2541_v36  ;;  %1354 = vst.msk [vmem:[%s2787_s13 + $0x8] sm:$0xff] %vm1136_vm1, %v2541_v36  ;;  %v1273_v31 = vsub.f32 %v2538_v25, %v2544_v37  ;;  %1353 = vst.msk [vmem:[%s2787_s13] sm:$0xff] %vm1136_vm1, %v2544_v37  ;;  %1291 = vperm.xlu1 %1978, %v2544_v37   ;;  %v1269_v25 = vld [vmem:[%s2788_s14] sm:$0xff] }
 0x201   : > { %v1264_v32 = vpop.xlane.xlu1 %1263  ;;  %v1261_v44 = vpop.xlane.xlu0 %1260 }
 0x202   : > { %v2572_v45 = vmax.f32 %v2549_v38, %v1264_v32  ;;  %v2575_v50 = vmax.f32 %v2554_v40, %v1261_v44 }
 0x204   : > { %v1276_v53 = vsub.f32 %v2549_v38, %v2572_v45  ;;  %1356 = vst.msk [vmem:[%s2787_s13 + $0x18] sm:$0xff] %vm1136_vm1, %v2572_v45  ;;  %v1275_v56 = vsub.f32 %v2554_v40, %v2575_v50  ;;  %1355 = vst.msk [vmem:[%s2787_s13 + $0x10] sm:$0xff] %vm1136_vm1, %v2575_v50  ;;  %1296 = vperm.xlu1 %1978, %v2541_v36  }
 0x208   : > { %1301 = vperm.xlu1 %1978, %v2575_v50   ;;  %v1271_v50 = vld [vmem:[%s2788_s14 + $0x10] sm:$0xff] }
 0x20c   : > { %1306 = vperm.xlu1 %1978, %v2572_v45  }
 0x22f   : > { %v1079_v58 = vpop.permute.xlu0 %1078 }
 0x230   : > { %v1096_v61 = vsub.f32 %v2375_v46, %v1079_v58  ;;  %v1097_v63 = vsub.f32 %v2377_v47, %v1079_v58 }
 0x232   : > { %v1104_v2 = vmul.f32 1.442695, %v1096_v61  ;;  %v1106_v4 = vmul.f32 1.442695, %v1097_v63 }
 0x233   : > { %v1084_v7 = vpop.permute.xlu1 %1083 }
 0x234   : > { %2025 = vpow2.f32 %v1104_v2  ;;  %v1098_v9 = vsub.f32 %v2379_v49, %v1084_v7  ;;  %v1099_v10 = vsub.f32 %v2383_v52, %v1084_v7 }
 0x235   : > { %2027 = vpow2.f32 %v1106_v4 }
 0x236   : > { %v1108_v12 = vmul.f32 1.442695, %v1098_v9  ;;  %v1110_v13 = vmul.f32 1.442695, %v1099_v10 }
 0x237   : > { %v1089_v14 = vpop.permute.xlu1 %1088 }
 0x238   : > { %2029 = vpow2.f32 %v1108_v12  ;;  %v1100_v15 = vsub.f32 %v2386_v55, %v1089_v14  ;;  %v1101_v16 = vsub.f32 %v2392_v60, %v1089_v14 }
 0x239   : > { %2031 = vpow2.f32 %v1110_v13 }
 0x23a   : > { %v1112_v46 = vmul.f32 1.442695, %v1100_v15  ;;  %v1114_v47 = vmul.f32 1.442695, %v1101_v16 }
 0x23b   : > { %v1094_v17 = vpop.permute.xlu1 %1093 }
 0x23c   : > { %2033 = vpow2.f32 %v1112_v46  ;;  %v1102_v18 = vsub.f32 %v2396_v0, %v1094_v17  ;;  %v1103_v49 = vsub.f32 %v2402_v6, %v1094_v17 }
 0x23d   : > { %2035 = vpow2.f32 %v1114_v47 }
 0x23e   : > { %v1116_v52 = vmul.f32 1.442695, %v1102_v18  ;;  %v1118_v19 = vmul.f32 1.442695, %v1103_v49 }
 0x240   : > { %2037 = vpow2.f32 %v1116_v52 }
 0x241   : > { %v2026_v20 = vpop.eup %2025  ;;  %2039 = vpow2.f32 %v1118_v19 }
 0x242   : > { %v2028_v21 = vpop.eup %2027 }
 0x243   : > { %v1120_v22 = vadd.f32 %v2028_v21, %v2026_v20  ;;  %v670_v20 = vld [vmem:[#allocation2 + $0x10] sm:$0xff] }
 0x245   : > { %v2030_v55 = vpop.eup %2029  ;;  %1121 = vadd.xlane.f32.xlu1 %v1120_v22 }
 0x246   : > { %v2032_v60 = vpop.eup %2031 }
 0x247   : > { %v1123_v23 = vadd.f32 %v2032_v60, %v2030_v55 }
 0x249   : > { %v2034_v34 = vpop.eup %2033  ;;  %1124 = vadd.xlane.f32.xlu0 %v1123_v23 }
 0x24a   : > { %v2036_v35 = vpop.eup %2035 }
 0x24b   : > { %v1126_v32 = vadd.f32 %v2036_v35, %v2034_v34  ;;  %v671_v34 = vld [vmem:[#allocation2] sm:$0xff] }
 0x24d   : > { %v2038_v44 = vpop.eup %2037  ;;  %1127 = vadd.xlane.f32.xlu0 %v1126_v32 }
 0x24e   : > { %v2040_v0 = vpop.eup %2039 }
 0x24f   : > { %v1129_v6 = vadd.f32 %v2040_v0, %v2038_v44 }
 0x251   : > { %1130 = vadd.xlane.f32.xlu1 %v1129_v6 }
 0x27b   : > { %v1292_v58 = vpop.permute.xlu1 %1291 }
 0x27c   : > { %v1309_v61 = vsub.f32 %v2428_v43, %v1292_v58  ;;  %v1310_v63 = vsub.f32 %v2430_v39, %v1292_v58 }
 0x27e   : > { %v1317_v2 = vmul.f32 1.442695, %v1309_v61  ;;  %v1319_v4 = vmul.f32 1.442695, %v1310_v63 }
 0x27f   : > { %v1297_v7 = vpop.permute.xlu1 %1296 }
 0x280   : > { %2041 = vpow2.f32 %v1317_v2  ;;  %v1311_v9 = vsub.f32 %v2424_v41, %v1297_v7  ;;  %v1312_v10 = vsub.f32 %v2426_v42, %v1297_v7  ;;  %v672_v7 = vld [vmem:[#allocation2 + $0x18] sm:$0xff] }
 0x281   : > { %2043 = vpow2.f32 %v1319_v4 }
 0x282   : > { %v1321_v12 = vmul.f32 1.442695, %v1311_v9  ;;  %v1323_v13 = vmul.f32 1.442695, %v1312_v10 }
 0x283   : > { %v1302_v14 = vpop.permute.xlu1 %1301 }
 0x284   : > { %2045 = vpow2.f32 %v1321_v12  ;;  %v1313_v15 = vsub.f32 %v2442_v29, %v1302_v14  ;;  %v1314_v16 = vsub.f32 %v2438_v27, %v1302_v14  ;;  %v1848_v29 = vpop.f32.mrf.mxu0  ;;  %v673_v14 = vld [vmem:[#allocation2 + $0x8] sm:$0xff] }
 0x285   : > { %2047 = vpow2.f32 %v1323_v13 }
 0x286   : > { %v1325_v43 = vmul.f32 1.442695, %v1313_v15  ;;  %v1327_v39 = vmul.f32 1.442695, %v1314_v16  ;;  %v1849_v21 = vpop.f32.mrf.mxu0  ;;  %v1064_v16 = vmul.f32 1.442695, %v1060_v54 }
 0x287   : > { %v1307_v46 = vpop.permute.xlu1 %1306  ;;  %v1850_v55 = vadd.f32 %v1849_v21, %v1848_v29  ;;  %v1283_v21 = vmul.f32 1.442695, %v1276_v53 }
 0x288   : > { %2049 = vpow2.f32 %v1325_v43  ;;  %v1315_v47 = vsub.f32 %v2440_v28, %v1307_v46  ;;  %v1316_v41 = vsub.f32 %v2436_v26, %v1307_v46  ;;  %v1851_v60 = vpop.f32.mrf.mxu0  ;;  %v1066_v43 = vmul.f32 1.442695, %v1061_v62 }
 0x289   : > { %2051 = vpow2.f32 %v1327_v39  ;;  %v851_v26 = vadd.f32 %v1850_v55, %v670_v20  ;;  %v1068_v39 = vmul.f32 1.442695, %v1062_v5  ;;  %v1070_v46 = vmul.f32 1.442695, %v1063_v11  ;;  %v1058_v5 = vld [vmem:[%s2786_s12 + $0x10] sm:$0xff] }
 0x28a   : > { %v1329_v42 = vmul.f32 1.442695, %v1315_v47  ;;  %v1331_v17 = vmul.f32 1.442695, %v1316_v41  ;;  %v1852_v35 = vpop.f32.mrf.mxu0  ;;  %v1281_v20 = vmul.f32 1.442695, %v1275_v56 }
 0x28b   : > { %855 = vst [vmem:[#allocation2 + $0x10] sm:$0xff] %v851_v26  ;;  %v1853_v44 = vadd.f32 %v1852_v35, %v1851_v60 }
 0x28c   : > { %2053 = vpow2.f32 %v1329_v42  ;;  %v1854_v0 = vpop.f32.mrf.mxu0 }
 0x28d   : > { %v2042_v18 = vpop.eup %2041  ;;  %2055 = vpow2.f32 %v1331_v17  ;;  %v852_v58 = vadd.f32 %v1853_v44, %v671_v34  ;;  %v1059_v17 = vld [vmem:[%s2786_s12 + $0x18] sm:$0xff] }
 0x28e   : > { %v2044_v49 = vpop.eup %2043  ;;  %v1855_v63 = vpop.f32.mrf.mxu0  ;;  %2057 = vpow2.f32 %v1064_v16 }
 0x28f   : > { %v1333_v52 = vadd.f32 %v2044_v49, %v2042_v18  ;;  %856 = vst [vmem:[#allocation2] sm:$0xff] %v852_v58  ;;  %v1856_v9 = vadd.f32 %v1855_v63, %v1854_v0  ;;  %2059 = vpow2.f32 %v1066_v43 }
 0x290   : > { %v1857_v4 = vpop.f32.mrf.mxu0  ;;  %2061 = vpow2.f32 %v1068_v39 }
 0x291   : > { %v2046_v19 = vpop.eup %2045  ;;  %1334 = vadd.xlane.f32.xlu0 %v1333_v52  ;;  %v853_v12 = vadd.f32 %v1856_v9, %v672_v7  ;;  %2063 = vpow2.f32 %v1070_v46 }
 0x292   : > { %v2048_v27 = vpop.eup %2047  ;;  %v1858_v10 = vpop.f32.mrf.mxu0 }
 0x293   : > { %v1336_v22 = vadd.f32 %v2048_v27, %v2046_v19  ;;  %v1859_v13 = vadd.f32 %v1858_v10, %v1857_v4  ;;  %857 = vst [vmem:[#allocation2 + $0x18] sm:$0xff] %v853_v12  ;;  %v1277_v19 = vmul.f32 1.442695, %v1273_v31  ;;  %v1279_v27 = vmul.f32 1.442695, %v1274_v30  ;;  %v1270_v30 = vld [vmem:[%s2788_s14 + $0x8] sm:$0xff] }
 0x295   : > { %v2050_v28 = vpop.eup %2049  ;;  %1337 = vadd.xlane.f32.xlu1 %v1336_v22  ;;  %v854_v15 = vadd.f32 %v1859_v13, %v673_v14  ;;  %2065 = vpow2.f32 %v1277_v19 }
 0x296   : > { %v2052_v23 = vpop.eup %2051  ;;  %2067 = vpow2.f32 %v1279_v27 }
 0x297   : > { %v1339_v32 = vadd.f32 %v2052_v23, %v2050_v28  ;;  %858 = vst [vmem:[#allocation2 + $0x8] sm:$0xff] %v854_v15  ;;  %2069 = vpow2.f32 %v1281_v20  ;;  %v1272_v28 = vld [vmem:[%s2788_s14 + $0x18] sm:$0xff] }
 0x298   : > { %2071 = vpow2.f32 %v1283_v21 }
 0x299   : > { %v2054_v6 = vpop.eup %2053  ;;  %1340 = vadd.xlane.f32.xlu0 %v1339_v32 }
 0x29a   : > { %v2056_v61 = vpop.eup %2055 }
 0x29b   : > { %v1342_v2 = vadd.f32 %v2056_v61, %v2054_v6  ;;  %v2058_v47 = vpop.eup %2057 }
 0x29c   : > { %v1072_v48 = vmul.f32 %v2058_v47, %v1056_v33  ;;  %v2060_v54 = vpop.eup %2059 }
 0x29d   : > { %1343 = vadd.xlane.f32.xlu1 %v1342_v2  ;;  %v1073_v62 = vmul.f32 %v2060_v54, %v1057_v57  ;;  %v2062_v1 = vpop.eup %2061 }
 0x29e   : > { %v1074_v11 = vmul.f32 %v2062_v1, %v1058_v5  ;;  %v2064_v41 = vpop.eup %2063 }
 0x29f   : > { %v1075_v49 = vmul.f32 %v2064_v41, %v1059_v17 }
 0x2a2   : > { %v2066_v22 = vpop.eup %2065 }
 0x2a3   : > { %v1285_v37 = vmul.f32 %v2066_v22, %v1269_v25  ;;  %v2068_v24 = vpop.eup %2067 }
 0x2a4   : > { %v1286_v38 = vmul.f32 %v2068_v24, %v1270_v30  ;;  %v2070_v31 = vpop.eup %2069 }
 0x2a5   : > { %v1287_v56 = vmul.f32 %v2070_v31, %v1271_v50  ;;  %v2072_v55 = vpop.eup %2071 }
 0x2a6   : > { %v1288_v23 = vmul.f32 %v2072_v55, %v1272_v28 }
 0x2ce   : > { %v1122_v51 = vpop.xlane.xlu1 %1121 }
 0x2cf   : > { %v1132_v59 = vadd.f32 %v1122_v51, %v1072_v48 }
 0x2d1   : > { %1137 = vst.msk [vmem:[%s2786_s12] sm:$0xff] %vm1136_vm1, %v1132_v59 }
 0x2d2   : > { %v1125_v3 = vpop.xlane.xlu0 %1124 }
 0x2d3   : > { %v1133_v8 = vadd.f32 %v1125_v3, %v1073_v62 }
 0x2d5   : > { %1138 = vst.msk [vmem:[%s2786_s12 + $0x8] sm:$0xff] %vm1136_vm1, %v1133_v8 }
 0x2d6   : > { %v1128_v42 = vpop.xlane.xlu0 %1127 }
 0x2d7   : > { %v1134_v18 = vadd.f32 %v1128_v42, %v1074_v11 }
 0x2d9   : > { %1139 = vst.msk [vmem:[%s2786_s12 + $0x10] sm:$0xff] %vm1136_vm1, %v1134_v18 }
 0x2da   : > { %v1131_v52 = vpop.xlane.xlu1 %1130 }
 0x2db   : > { %v1135_v29 = vadd.f32 %v1131_v52, %v1075_v49 }
 0x2dd   : > { %1140 = vst.msk [vmem:[%s2786_s12 + $0x18] sm:$0xff] %vm1136_vm1, %v1135_v29 }
 0x31a   : > { %v1335_v36 = vpop.xlane.xlu0 %1334 }
 0x31b   : > { %v1345_v40 = vadd.f32 %v1335_v36, %v1285_v37 }
 0x31d   : > { %1349 = vst.msk [vmem:[%s2788_s14] sm:$0xff] %vm1136_vm1, %v1345_v40 }
 0x31e   : > { %v1338_v45 = vpop.xlane.xlu1 %1337 }
 0x31f   : > { %v1346_v53 = vadd.f32 %v1338_v45, %v1286_v38 }
 0x321   : > { %1350 = vst.msk [vmem:[%s2788_s14 + $0x8] sm:$0xff] %vm1136_vm1, %v1346_v53 }
 0x322   : > { %v1341_v60 = vpop.xlane.xlu0 %1340 }
 0x323   : > { %v1347_v26 = vadd.f32 %v1341_v60, %v1287_v56 }
 0x325   : > { %1351 = vst.msk [vmem:[%s2788_s14 + $0x10] sm:$0xff] %vm1136_vm1, %v1347_v26  ;;  %1360 = sbr.rel (%p1786_p11) target bundleno = 1157 (0x485), region = 106 }
 0x326   : > { %v1344_v34 = vpop.xlane.xlu1 %1343 }
 0x327   : > { %v1348_v35 = vadd.f32 %v1344_v34, %v1288_v23 }
 0x329   : > { %1352 = vst.msk [vmem:[%s2788_s14 + $0x18] sm:$0xff] %vm1136_vm1, %v1348_v35 }
 0x32a   : > { %v1831_v32 = vld [vmem:[%s2781_s7 + $0x38] sm:$0xff]   ;;  %v1830_v44 = vld [vmem:[%s2781_s7 + $0x30] sm:$0xff]   ;;  %v1829_v61 = vld [vmem:[%s2781_s7 + $0x28] sm:$0xff]  }
 0x32b   : > { %v1824_v0 = vunpack.c.h.bf16 %v1831_v32  ;;  %v1823_v6 = vunpack.c.l.bf16 %v1831_v32  ;;  %v1820_v58 = vunpack.c.h.bf16 %v1830_v44  ;;  %v1819_v63 = vunpack.c.l.bf16 %v1830_v44  ;;  %v1828_v4 = vld [vmem:[%s2781_s7 + $0x20] sm:$0xff]   ;;  %v1827_v10 = vld [vmem:[%s2781_s7 + $0x18] sm:$0xff]   ;;  %v1826_v14 = vld [vmem:[%s2781_s7 + $0x10] sm:$0xff]  }
 0x32c   : > { %v1816_v2 = vunpack.c.h.bf16 %v1829_v61  ;;  %v1815_v7 = vunpack.c.l.bf16 %v1829_v61  ;;  %v1812_v9 = vunpack.c.h.bf16 %v1828_v4  ;;  %v1811_v12 = vunpack.c.l.bf16 %v1828_v4  ;;  %v1825_v43 = vld [vmem:[%s2781_s7 + $0x8] sm:$0xff]   ;;  %v1794_v47 = vld [vmem:[%s2781_s7] sm:$0xff]   ;;  %v1361_v33 = vld [vmem:[#allocation2 + $0x10] sm:$0xff] }
 0x32d   : > { %1880 = vmatprep.subr.mxu0 %v1824_v0  ;;  %1918 = vmatprep.subr.mxu1 %v1824_v0  ;;  %v1808_v13 = vunpack.c.h.bf16 %v1827_v10  ;;  %v1807_v15 = vunpack.c.l.bf16 %v1827_v10  ;;  %v1804_v16 = vunpack.c.h.bf16 %v1826_v14  ;;  %v1803_v39 = vunpack.c.l.bf16 %v1826_v14  ;;  %v1787_v48 = vld [vmem:[%s2780_s6] ss:$0 sm:$0xff]  ;;  %v1363_v54 = vld [vmem:[#allocation2 + $0x18] sm:$0xff]  ;;  %v1364_v59 = vld [vmem:[#allocation2 + $0x8] sm:$0xff] }
 0x32e   : > { %1881 = vmatpush3.msra.mxu0 %v1824_v0  ;;  %1934 = vmatpush3.msra.mxu1 %v1824_v0  ;;  %v1800_v46 = vunpack.c.h.bf16 %v1825_v43  ;;  %v1799_v51 = vunpack.c.l.bf16 %v1825_v43  ;;  %v1362_v57 = vld [vmem:[#allocation2] sm:$0xff]  ;;  %v1796_v62 = vunpack.c.h.bf16 %v1794_v47  ;;  %v1372_v1 = vadd.f32 %v1787_v48, %v1361_v33 }
 0x32f   : > { %1882 = vmatprep.subr.mxu0 %v1823_v6  ;;  %1919 = vmatprep.subr.mxu1 %v1823_v6  ;;  %v1374_v3 = vadd.f32 %v1787_v48, %v1363_v54  ;;  %v1373_v5 = vadd.f32 %v1787_v48, %v1362_v57  ;;  %v1375_v8 = vadd.f32 %v1787_v48, %v1364_v59  ;;  %v1795_v11 = vunpack.c.l.bf16 %v1794_v47  ;;  %v1788_v49 = vld [vmem:[%s2782_s8] ss:$0 sm:$0xff] }
 0x330   : > { %1883 = vmatpush3.msra.mxu0 %v1823_v6  ;;  %1935 = vmatpush3.msra.mxu1 %v1823_v6  ;;  %v1376_v41 = vmax.f32 %v1372_v1, 0.0 }
 0x331   : > { %1884 = vmatprep.subr.mxu0 %v1820_v58  ;;  %1920 = vmatprep.subr.mxu1 %v1820_v58  ;;  %v1378_v42 = vmax.f32 %v1374_v3, 0.0  ;;  %v1377_v17 = vmax.f32 %v1373_v5, 0.0  ;;  %v1379_v18 = vmax.f32 %v1375_v8, 0.0 }
 0x332   : > { %1885 = vmatpush3.msra.mxu0 %v1820_v58  ;;  %1936 = vmatpush3.msra.mxu1 %v1820_v58 }
 0x333   : > { %1886 = vmatprep.subr.mxu0 %v1819_v63  ;;  %1921 = vmatprep.subr.mxu1 %v1819_v63 }
 0x334   : > { %1887 = vmatpush3.msra.mxu0 %v1819_v63  ;;  %1937 = vmatpush3.msra.mxu1 %v1819_v63 }
 0x335   : > { %1888 = vmatprep.subr.mxu0 %v1816_v2  ;;  %1922 = vmatprep.subr.mxu1 %v1816_v2 }
 0x336   : > { %1889 = vmatpush3.msra.mxu0 %v1816_v2  ;;  %1938 = vmatpush3.msra.mxu1 %v1816_v2 }
 0x337   : > { %1890 = vmatprep.subr.mxu0 %v1815_v7  ;;  %1923 = vmatprep.subr.mxu1 %v1815_v7 }
 0x338   : > { %1891 = vmatpush3.msra.mxu0 %v1815_v7  ;;  %1939 = vmatpush3.msra.mxu1 %v1815_v7 }
 0x339   : > { %1892 = vmatprep.subr.mxu0 %v1812_v9  ;;  %1924 = vmatprep.subr.mxu1 %v1812_v9 }
 0x33a   : > { %1893 = vmatpush3.msra.mxu0 %v1812_v9  ;;  %1940 = vmatpush3.msra.mxu1 %v1812_v9 }
 0x33b   : > { %1894 = vmatprep.subr.mxu0 %v1811_v12  ;;  %1925 = vmatprep.subr.mxu1 %v1811_v12 }
 0x33c   : > { %1895 = vmatpush3.msra.mxu0 %v1811_v12  ;;  %1941 = vmatpush3.msra.mxu1 %v1811_v12 }
 0x33d   : > { %1896 = vmatprep.subr.mxu0 %v1808_v13  ;;  %1926 = vmatprep.subr.mxu1 %v1808_v13 }
 0x33e   : > { %1897 = vmatpush3.msra.mxu0 %v1808_v13  ;;  %1942 = vmatpush3.msra.mxu1 %v1808_v13 }
 0x33f   : > { %1898 = vmatprep.subr.mxu0 %v1807_v15  ;;  %1927 = vmatprep.subr.mxu1 %v1807_v15 }
 0x340   : > { %1899 = vmatpush3.msra.mxu0 %v1807_v15  ;;  %1943 = vmatpush3.msra.mxu1 %v1807_v15 }
 0x341   : > { %1900 = vmatprep.subr.mxu0 %v1804_v16  ;;  %1928 = vmatprep.subr.mxu1 %v1804_v16 }
 0x342   : > { %1901 = vmatpush3.msra.mxu0 %v1804_v16  ;;  %1944 = vmatpush3.msra.mxu1 %v1804_v16 }
 0x343   : > { %1902 = vmatprep.subr.mxu0 %v1803_v39  ;;  %1929 = vmatprep.subr.mxu1 %v1803_v39 }
 0x344   : > { %1903 = vmatpush3.msra.mxu0 %v1803_v39  ;;  %1945 = vmatpush3.msra.mxu1 %v1803_v39  ;;  %v1789_v39 = vld [vmem:[%s2800_s22] ss:$0 sm:$0xff] }
 0x345   : > { %1904 = vmatprep.subr.mxu0 %v1800_v46  ;;  %1930 = vmatprep.subr.mxu1 %v1800_v46 }
 0x346   : > { %1905 = vmatpush3.msra.mxu0 %v1800_v46  ;;  %1946 = vmatpush3.msra.mxu1 %v1800_v46 }
 0x347   : > { %1906 = vmatprep.subr.mxu0 %v1799_v51  ;;  %1931 = vmatprep.subr.mxu1 %v1799_v51 }
 0x348   : > { %1907 = vmatpush3.msra.mxu0 %v1799_v51  ;;  %1947 = vmatpush3.msra.mxu1 %v1799_v51 }
 0x349   : > { %1908 = vmatprep.subr.mxu0 %v1796_v62  ;;  %1932 = vmatprep.subr.mxu1 %v1796_v62 }
 0x34a   : > { %1909 = vmatpush3.msra.mxu0 %v1796_v62  ;;  %1948 = vmatpush3.msra.mxu1 %v1796_v62 }
 0x34b   : > { %1910 = vmatprep.subr.mxu0 %v1795_v11  ;;  %1933 = vmatprep.subr.mxu1 %v1795_v11 }
 0x34c   : > { %1911 = vmatpush3.msra.mxu0 %v1795_v11  ;;  %1949 = vmatpush3.msra.mxu1 %v1795_v11 }
 0x34d   : > { %1912 = vmatprep.mubr.f32.mxu0 %v1376_v41  ;;  %1915 = vmatprep.mubr.f32.mxu1 %v1378_v42 }
 0x34e   : > { %1913 = vmatmul.mubr.f32.vlgmr.msra.gmra.mxu0 %v1377_v17  ;;  %1916 = vmatmul.mubr.f32.vlgmr.msra.gmra.mxu1 %v1379_v18 }
 0x40e   : > { %v1914_v52 = vpop.f32.mrf.mxu0  ;;  %v1917_v29 = vpop.f32.mrf.mxu1 }
 0x40f   : > { %v1491_v19 = vadd.f32 %v1914_v52, %v1788_v49  ;;  %v1501_v22 = vadd.f32 %v1917_v29, %v1788_v49 }
 0x410   : > { %v1485_v27 = vpop.f32.mrf.mxu0  ;;  %v1495_v20 = vpop.f32.mrf.mxu1 }
 0x411   : > { %v1506_v21 = vmul.f32 0.0, %v1491_v19  ;;  %v1486_v25 = vadd.f32 %v1788_v49, %v1485_v27  ;;  %v1496_v37 = vadd.f32 %v1788_v49, %v1495_v20  ;;  %v1508_v30 = vmul.f32 0.0, %v1501_v22 }
 0x413   : > { %v1509_v24 = vadd.f32 %v1506_v21, %v1486_v25  ;;  %v1507_v36 = vmul.f32 0.0, %v1496_v37 }
 0x415   : > { %v1510_v40 = vadd.f32 %v1509_v24, %v1507_v36 }
 0x417   : > { %v1511_v38 = vadd.f32 %v1510_v40, %v1508_v30 }
 0x419   : > { %v1512_v31 = vrot.slane %v1511_v38, 4 }
 0x41b   : > { %v1513_v45 = vadd.f32 %v1512_v31, %v1511_v38 }
 0x41d   : > { %v1514_v50 = vrot.slane %v1513_v45, 2 }
 0x41f   : > { %v1515_v53 = vadd.f32 %v1514_v50, %v1513_v45 }
 0x421   : > { %v1516_v56 = vrot.slane %v1515_v53, 1 }
 0x423   : > { %v1517_v55 = vadd.f32 %v1516_v56, %v1515_v53 }
 0x425   : > { %v1518_v60 = vmul.f32 0.125, %v1517_v55 }
 0x427   : > { %v1519_v28 = vsub.f32 %v1486_v25, %v1518_v60  ;;  %v1520_v26 = vsub.f32 %v1491_v19, %v1518_v60  ;;  %v1521_v23 = vsub.f32 %v1496_v37, %v1518_v60  ;;  %v1522_v34 = vsub.f32 %v1501_v22, %v1518_v60 }
 0x429   : > { %v1524_v35 = vmul.f32 %v1520_v26, %v1520_v26  ;;  %v1525_v32 = vmul.f32 %v1521_v23, %v1521_v23  ;;  %v1523_v44 = vmul.f32 %v1519_v28, %v1519_v28  ;;  %v1526_v0 = vmul.f32 %v1522_v34, %v1522_v34 }
 0x42b   : > { %v1528_v6 = vmul.f32 0.0, %v1524_v35  ;;  %v1529_v58 = vmul.f32 0.0, %v1525_v32  ;;  %v1530_v63 = vmul.f32 0.0, %v1526_v0 }
 0x42d   : > { %v1531_v61 = vadd.f32 %v1528_v6, %v1523_v44 }
 0x42f   : > { %v1532_v2 = vadd.f32 %v1531_v61, %v1529_v58 }
 0x431   : > { %v1533_v4 = vadd.f32 %v1532_v2, %v1530_v63 }
 0x433   : > { %v1534_v7 = vrot.slane %v1533_v4, 4 }
 0x435   : > { %v1535_v9 = vadd.f32 %v1534_v7, %v1533_v4 }
 0x437   : > { %v1536_v10 = vrot.slane %v1535_v9, 2 }
 0x439   : > { %v1537_v12 = vadd.f32 %v1536_v10, %v1535_v9 }
 0x43b   : > { %v1538_v13 = vrot.slane %v1537_v12, 1 }
 0x43d   : > { %v1539_v14 = vadd.f32 %v1538_v13, %v1537_v12 }
 0x43f   : > { %v1540_v15 = vmul.f32 0.125, %v1539_v14 }
 0x441   : > { %v1541_v16 = vadd.f32 0.001, %v1540_v15 }
 0x443   : > { %2073 = vrsqrt.f32 %v1541_v16 }
 0x450   : > { %v2074_v43 = vpop.eup %2073 }
 0x451   : > { %v1543_v46 = vmul.f32 %v2074_v43, %v1519_v28  ;;  %v1544_v47 = vmul.f32 %v2074_v43, %v1520_v26  ;;  %v1545_v33 = vmul.f32 %v2074_v43, %v1521_v23  ;;  %v1546_v48 = vmul.f32 %v2074_v43, %v1522_v34 }
 0x453   : > { %v2724_v54 = vadd.f32 %v1789_v39, %v1543_v46  ;;  %v2726_v51 = vadd.f32 %v1789_v39, %v1544_v47  ;;  %v2728_v57 = vadd.f32 %v1789_v39, %v1545_v33  ;;  %v2730_v59 = vadd.f32 %v1789_v39, %v1546_v48 }
 0x455   : > { %v1569_v62 = vand.u32 2147483647, %v2724_v54  ;;  %v1570_v1 = vand.u32 2147483647, %v2726_v51  ;;  %v1571_v3 = vand.u32 2147483647, %v2728_v57  ;;  %vm1561_vm4 = vcmp.ne.f32.partialorder %v2724_v54, %v2724_v54 }
 0x456   : > { %v1572_v5 = vand.u32 2147483647, %v2730_v59  ;;  %v1557_v55 = vmax.f32 %v2724_v54, 0.0  ;;  %v1558_v60 = vmax.f32 %v2726_v51, 0.0  ;;  %v1559_v28 = vmax.f32 %v2728_v57, 0.0 }
 0x457   : > { %v1573_v8 = vsub.f32 0.0, %v1569_v62  ;;  %v1574_v11 = vsub.f32 0.0, %v1570_v1  ;;  %v1575_v41 = vsub.f32 0.0, %v1571_v3  ;;  %v1560_v34 = vmax.f32 %v2730_v59, 0.0 }
 0x458   : > { %v1576_v42 = vsub.f32 0.0, %v1572_v5  ;;  %vm1562_vm6 = vcmp.ne.f32.partialorder %v2726_v51, %v2726_v51  ;;  %vm1563_vm8 = vcmp.ne.f32.partialorder %v2728_v57, %v2728_v57  ;;  %vm1564_vm9 = vcmp.ne.f32.partialorder %v2730_v59, %v2730_v59 }
 0x459   : > { %v1577_v17 = vmul.f32 1.442695, %v1573_v8  ;;  %v1579_v18 = vmul.f32 1.442695, %v1574_v11  ;;  %v1581_v49 = vmul.f32 1.442695, %v1575_v41 }
 0x45a   : > { %v1583_v52 = vmul.f32 1.442695, %v1576_v42 }
 0x45b   : > { %2075 = vpow2.f32 %v1577_v17 }
 0x45c   : > { %2077 = vpow2.f32 %v1579_v18 }
 0x45d   : > { %2079 = vpow2.f32 %v1581_v49 }
 0x45e   : > { %2081 = vpow2.f32 %v1583_v52 }
 0x468   : > { %v2076_v29 = vpop.eup %2075 }
 0x469   : > { %v2078_v19 = vpop.eup %2077  ;;  %v1585_v27 = vadd.f32 1.0, %v2076_v29  ;;  %v1588_v24 = vmul.f32 -0.5, %v2076_v29  ;;  %v1591_v31 = vand.u32 2147483647, %v2076_v29 }
 0x46a   : > { %v2080_v20 = vpop.eup %2079  ;;  %v1594_v21 = vadd.f32 1.0, %v2078_v19  ;;  %v1597_v36 = vmul.f32 -0.5, %v2078_v19  ;;  %v1600_v50 = vand.u32 2147483647, %v2078_v19 }
 0x46b   : > { %v2082_v22 = vpop.eup %2081  ;;  %2083 = vlog2.f32 %v1585_v27  ;;  %v1603_v25 = vadd.f32 1.0, %v2080_v20  ;;  %v1606_v30 = vmul.f32 -0.5, %v2080_v20  ;;  %v1589_v40 = vadd.f32 1.0, %v1588_v24 }
 0x46c   : > { %2085 = vlog2.f32 %v1594_v21  ;;  %v1612_v37 = vadd.f32 1.0, %v2082_v22  ;;  %v1615_v38 = vmul.f32 -0.5, %v2082_v22  ;;  %v1598_v45 = vadd.f32 1.0, %v1597_v36 }
 0x46d   : > { %2087 = vlog2.f32 %v1603_v25  ;;  %v1607_v53 = vadd.f32 1.0, %v1606_v30  ;;  %v1609_v26 = vand.u32 2147483647, %v2080_v20  ;;  %v1590_v32 = vmul.f32 %v2076_v29, %v1589_v40 }
 0x46e   : > { %2089 = vlog2.f32 %v1612_v37  ;;  %v1616_v44 = vadd.f32 1.0, %v1615_v38  ;;  %vm1592_vm2 = vcmp.lt.f32.partialorder %v1591_v31, 0.0004427343  ;;  %v1599_v58 = vmul.f32 %v2078_v19, %v1598_v45 }
 0x46f   : > { %v1618_v61 = vand.u32 2147483647, %v2082_v22  ;;  %vm1601_vm3 = vcmp.lt.f32.partialorder %v1600_v50, 0.0004427343  ;;  %v1608_v4 = vmul.f32 %v2080_v20, %v1607_v53  ;;  %vm1610_vm5 = vcmp.lt.f32.partialorder %v1609_v26, 0.0004427343 }
 0x470   : > { %v1617_v14 = vmul.f32 %v2082_v22, %v1616_v44 }
 0x471   : > { %vm1619_vm7 = vcmp.lt.f32.partialorder %v1618_v61, 0.0004427343 }
 0x478   : > { %v2084_v56 = vpop.eup %2083 }
 0x479   : > { %v2086_v23 = vpop.eup %2085  ;;  %v1587_v35 = vmul.f32 0.6931472, %v2084_v56 }
 0x47a   : > { %v2088_v0 = vpop.eup %2087  ;;  %v1596_v6 = vmul.f32 0.6931472, %v2086_v23 }
 0x47b   : > { %v1593_v63 = vsel %vm1592_vm2, %v1590_v32, %v1587_v35  ;;  %v1605_v2 = vmul.f32 0.6931472, %v2088_v0  ;;  %v2090_v7 = vpop.eup %2089 }
 0x47c   : > { %v1602_v9 = vsel %vm1601_vm3, %v1599_v58, %v1596_v6  ;;  %v1621_v10 = vadd.f32 %v1593_v63, %v1557_v55  ;;  %v1614_v13 = vmul.f32 0.6931472, %v2090_v7 }
 0x47d   : > { %v1611_v12 = vsel %vm1610_vm5, %v1608_v4, %v1605_v2  ;;  %v1622_v15 = vadd.f32 %v1602_v9, %v1558_v60 }
 0x47e   : > { %v1623_v16 = vadd.f32 %v1611_v12, %v1559_v28  ;;  %v1625_v43 = vsel %vm1561_vm4, %v2724_v54, %v1621_v10  ;;  %v1620_v39 = vsel %vm1619_vm7, %v1617_v14, %v1614_v13 }
 0x47f   : > { %v1626_v46 = vsel %vm1562_vm6, %v2726_v51, %v1622_v15  ;;  %v1629_v47 = vmax.f32 %v1625_v43, 1e-05  ;;  %v1624_v33 = vadd.f32 %v1620_v39, %v1560_v34 }
 0x480   : > { %v1627_v48 = vsel %vm1563_vm8, %v2728_v57, %v1623_v16  ;;  %v1630_v62 = vmax.f32 %v1626_v46, 1e-05 }
 0x481   : > { %v1631_v1 = vmax.f32 %v1627_v48, 1e-05  ;;  %1633 = vst [vmem:[%s2801_s16] sm:$0xff] %v1629_v47  ;;  %v1628_v54 = vsel %vm1564_vm9, %v2730_v59, %v1624_v33 }
 0x482   : > { %1634 = vst [vmem:[%s2801_s16 + $0x8] sm:$0xff] %v1630_v62  ;;  %v1632_v51 = vmax.f32 %v1628_v54, 1e-05 }
 0x483   : > { %1635 = vst [vmem:[%s2801_s16 + $0x10] sm:$0xff] %v1631_v1 }
 0x484   : > { %1636 = vst [vmem:[%s2801_s16 + $0x18] sm:$0xff] %v1632_v51 }
 0x485 PF: > { %s2802_s15 = sld [smem:[#allocation5_spill]] }
 0x486   : > { %s2803_s29 = sld [smem:[#allocation4_spill]] }
 0x487   : > { %s2804_s30 = sld [smem:[#allocation6_spill]] }
 0x48b   : > { %p22_p12 = scmp.ge.s32.totalorder %s2802_s15, 5  }
 0x48d   :  { %24 = sbr.rel (!%p22_p12) target bundleno = 6 (0x6), region = 181 }

</bundles_post_ra>
